<compile_context>
chip_gen: v7x
topology: tpu7x:2x2x1
jax: 0.10.0
libtpu: 0.0.40
codegen_flags: <defaults>
</compile_context>

<pallas_src>
import functools

import jax
import jax.numpy as jnp
from jax import lax
from jax.experimental import pallas as pl
from jax.experimental.pallas import tpu as pltpu


_DEFAULT_BLOCK_BUDGET = 4 * 1024 * 1024   # bytes of f32 working set per input block
_VMEM_LIMIT_BYTES = 32 * 1024 * 1024      # explicit scoped-VMEM limit (safe on v5e/v6e/v7x)


# -----------------------------------------------------------------------------
# Kernels
# -----------------------------------------------------------------------------
def _stat_pool_full_kernel(x_ref, o_ref, *, inv_t, eps):
    """Whole time axis in one block: exact two-pass mean/std (no cancellation)."""
    x = x_ref[...].astype(jnp.float32)                       # (tr, F, T)
    mean = jnp.sum(x, axis=-1, keepdims=True) * inv_t        # (tr, F, 1)
    d = x - mean                                             # lane-broadcast, VPU only
    var = jnp.sum(d * d, axis=-1, keepdims=True) * inv_t     # (tr, F, 1)
    std = jnp.sqrt(var + eps)
    # One small sublane->lane relayout per row block for the (mean, std) writes.
    o_ref[:, 0:1, :] = mean[:, :, 0][:, None, :].astype(o_ref.dtype)
    o_ref[:, 1:2, :] = std[:, :, 0][:, None, :].astype(o_ref.dtype)


def _stat_pool_tiled_kernel(x_ref, o_ref, m0_ref, s_ref, q_ref, *,
                            inv_t, eps, true_t, block_t, ragged_t):
    """Time-tiled fallback for huge T.

    x_ref: (tr, F, tT) chunk.  o_ref: (tr, 2, F).
    m0_ref: (tr, F, 1)   first-chunk mean (numerical shift).
    s_ref / q_ref: (tr, F, 128) lane-resident partial sums of (x-m0) and (x-m0)^2.
    """
    t = pl.program_id(1)
    x = x_ref[...].astype(jnp.float32)                       # (tr, F, tT)

    @pl.when(t == 0)
    def _():
        # Chunk 0 is always full (tT < T), so this is an exact chunk mean.
        m0_ref[...] = jnp.sum(x, axis=-1, keepdims=True) * (1.0 / block_t)
        s_ref[...] = jnp.zeros_like(s_ref)
        q_ref[...] = jnp.zeros_like(q_ref)

    d = x - m0_ref[...]                                      # shifted -> stable sums
    if ragged_t:
        # Mask the out-of-range tail of the last chunk (zeros contribute nothing).
        lane = lax.broadcasted_iota(jnp.int32, d.shape, 2)
        d = jnp.where(lane < (true_t - t * block_t), d, 0.0)

    # Lane-resident accumulation: pure VPU adds per chunk, no per-chunk XLU reduce.
    s = s_ref[...]
    q = q_ref[...]
    for k in range(block_t // 128):
        seg = d[:, :, k * 128:(k + 1) * 128]                 # static, 128-aligned view
        s = s + seg
        q = q + seg * seg
    s_ref[...] = s
    q_ref[...] = q

    @pl.when(t == pl.num_programs(1) - 1)
    def _():
        s_tot = jnp.sum(s_ref[...], axis=-1, keepdims=True)  # (tr, F, 1)
        q_tot = jnp.sum(q_ref[...], axis=-1, keepdims=True)
        mshift = s_tot * inv_t
        mean = m0_ref[...] + mshift
        var = jnp.maximum(q_tot * inv_t - mshift * mshift, 0.0)
        std = jnp.sqrt(var + eps)
        o_ref[:, 0:1, :] = mean[:, :, 0][:, None, :].astype(o_ref.dtype)
        o_ref[:, 1:2, :] = std[:, :, 0][:, None, :].astype(o_ref.dtype)


# -----------------------------------------------------------------------------
# Tile selection (budget in f32 working elements)
# -----------------------------------------------------------------------------
def _choose_tiles(R, F, T, elem_budget):
    """Return (tr, tT). tT == T means one full-T block per row block (no time axis)."""
    full_row = F * T
    if full_row <= elem_budget:
        tr = 1
        for c in (64, 32, 16, 8, 4, 2):
            if c * full_row <= elem_budget:
                tr = c
                break
        tr = min(tr, R)
        # Keep >= 2 row blocks when halving still leaves large blocks
        # (lets megacore / dual-TC v7x shard the grid; harmless elsewhere).
        if tr >= R and tr > 1 and (tr // 2) * full_row * 4 >= (512 << 10):
            tr = max(1, -(-R // 2))
        return tr, T

    # Time-tiled path: lane-aligned chunk + lane-resident accumulator cost per row.
    acc_row = F * (2 * 128 + 1)
    tT = None
    for cand in (2048, 1024, 512, 256, 128):
        if cand < T and F * cand + acc_row <= elem_budget:
            tT = cand
            break
    if tT is None:
        # Degenerate (huge F or tiny T vs. budget): fall back to full-T, one row.
        return 1, T
    per_row = F * tT + acc_row
    tr = 1
    for c in (64, 32, 16, 8, 4, 2):
        if c * per_row <= elem_budget:
            tr = c
            break
    return min(tr, R), tT


# -----------------------------------------------------------------------------
# Wrapper
# -----------------------------------------------------------------------------
def statistic_pooling(x, input_dim=None, *, eps=1e-8,
                      block_budget=_DEFAULT_BLOCK_BUDGET, interpret=False):
    """Pallas TPU StatisticPooling.forward for x of shape (..., F, T)."""
    assert x.ndim >= 2, "StatisticPooling expects at least 2 dims (..., F, T)"
    *lead, T = x.shape
    F = lead[-1]
    R = 1
    for d in lead[:-1]:
        R *= d
    if input_dim is None:
        input_dim = F

    x3 = x.reshape(R, F, T)                     # contiguous reshape, metadata only

    elem_budget = max(block_budget // 4, 8 * 128)
    tr, tT = _choose_tiles(R, F, T, elem_budget)

    if tT == T:
        # Path A: full-T row blocks, exact two-pass in-block.
        grid = (pl.cdiv(R, tr),)
        kernel = functools.partial(_stat_pool_full_kernel, inv_t=1.0 / T, eps=eps)
        in_specs = [pl.BlockSpec((tr, F, T), lambda r: (r, 0, 0))]
        out_specs = pl.BlockSpec((tr, 2, F), lambda r: (r, 0, 0))
        scratch = []
        dims = ("parallel",)
    else:
        # Path B: time-tiled with resident, shifted, lane-resident accumulators.
        grid = (pl.cdiv(R, tr), pl.cdiv(T, tT))
        kernel = functools.partial(
            _stat_pool_tiled_kernel, inv_t=1.0 / T, eps=eps,
            true_t=T, block_t=tT, ragged_t=(T % tT != 0))
        in_specs = [pl.BlockSpec((tr, F, tT), lambda r, t: (r, 0, t))]
        out_specs = pl.BlockSpec((tr, 2, F), lambda r, t: (r, 0, 0))
        scratch = [pltpu.VMEM((tr, F, 1), jnp.float32),
                   pltpu.VMEM((tr, F, 128), jnp.float32),
                   pltpu.VMEM((tr, F, 128), jnp.float32)]
        dims = ("parallel", "arbitrary")

    out = pl.pallas_call(
        kernel,
        out_shape=jax.ShapeDtypeStruct((R, 2, F), x.dtype),
        grid=grid,
        in_specs=in_specs,
        out_specs=out_specs,
        scratch_shapes=scratch,
        compiler_params=pltpu.CompilerParams(
            dimension_semantics=dims,
            vmem_limit_bytes=_VMEM_LIMIT_BYTES,
        ),
        interpret=interpret,
    )(x3)

    # (R, 2, F) row-major flatten == torch.cat([mean, std], dim=-1); both reshapes are
    # metadata-only (contiguous), no concatenate / extra HBM round trips.
    return out.reshape(R, 2 * F).reshape(-1, 2 * input_dim)


# -----------------------------------------------------------------------------
# Pure-JAX reference (mirrors the PyTorch module) for correctness checking
# -----------------------------------------------------------------------------
def _statistic_pooling_ref(x, input_dim, eps=1e-8):
    T = x.shape[-1]
    mean = jnp.mean(x, axis=-1)
    var = jnp.sum((x - mean[..., None]) ** 2, axis=-1) / T   # two-pass, biased
    std = jnp.sqrt(var + eps)
    return jnp.concatenate([mean, std], axis=-1).reshape(-1, 2 * input_dim)


# -----------------------------------------------------------------------------
# Demo / correctness checks
# -----------------------------------------------------------------------------
if __name__ == "__main__":
    key = jax.random.PRNGKey(0)
    k1, k2, k3, k4 = jax.random.split(key, 4)

    # 1) Canonical x-vector usage (B, D, T): full-T row blocks (Path A).
    B, D, T = 2, 64, 1024
    x = jax.random.normal(k1, (B, D, T), jnp.float32) * 1.5 + 0.7
    out = jax.block_until_ready(statistic_pooling(x, input_dim=D))
    ref = _statistic_pooling_ref(x, D)
    assert out.shape == (B, 2 * D), out.shape
    assert bool(jnp.all(jnp.isfinite(out)))
    assert bool(jnp.allclose(out, ref, rtol=1e-4, atol=1e-4)), float(
        jnp.max(jnp.abs(out - ref)))

    # 2) 4-D ResNet embedding usage (B, C, H, W), pooled over W, viewed as (-1, 2*C*H).
    B2, C2, H2, W2 = 2, 3, 16, 40
    x2 = jax.random.normal(k2, (B2, C2, H2, W2), jnp.float32)
    in_dim2 = C2 * H2
    out2 = jax.block_until_ready(statistic_pooling(x2, input_dim=in_dim2))
    ref2 = _statistic_pooling_ref(x2, in_dim2)
    assert out2.shape == (B2, 2 * in_dim2), out2.shape
    assert bool(jnp.allclose(out2, ref2, rtol=1e-4, atol=1e-4)), float(
        jnp.max(jnp.abs(out2 - ref2)))

    # 3) Ragged row blocks (R not a multiple of tr): small budget forces tr=2 over R=5.
    x3 = jax.random.normal(k3, (5, 64, 256), jnp.float32) - 0.3
    out3 = jax.block_until_ready(
        statistic_pooling(x3, input_dim=64, block_budget=128 * 1024))
    ref3 = _statistic_pooling_ref(x3, 64)
    assert out3.shape == (5, 128), out3.shape
    assert bool(jnp.allclose(out3, ref3, rtol=1e-4, atol=1e-4)), float(
        jnp.max(jnp.abs(out3 - ref3)))

    # 4) Time-tiled fallback with a ragged last chunk (budget forces tT=512 on T=1000),
    #    with a non-zero mean to exercise the shifted (cancellation-safe) accumulation.
    x4 = jax.random.normal(k4, (2, 32, 1000), jnp.float32) * 0.5 + 2.0
    out4 = jax.block_until_ready(
        statistic_pooling(x4, input_dim=32, block_budget=100 * 1024))
    ref4 = _statistic_pooling_ref(x4, 32)
    assert out4.shape == (2, 64), out4.shape
    assert bool(jnp.allclose(out4, ref4, rtol=1e-4, atol=1e-4)), float(
        jnp.max(jnp.abs(out4 - ref4)))

    print("KERNEL_OK")
</pallas_src>

<mosaic_0001>
module attributes {stable_mosaic.version = 11 : i64} {
  func.func @_stat_pool_full_kernel(%arg0: i32, %arg1: memref<2x64x1024xf32, #tpu.memory_space<vmem>>, %arg2: memref<2x2x64xf32, #tpu.memory_space<vmem>>) attributes {dimension_semantics = [#tpu.dimension_semantics<parallel>], iteration_bounds = array<i64: 1>, scalar_prefetch = 0 : i64, scratch_operands = 0 : i64, tpu.core_type = #tpu.core_type<tc>, window_params = [{transform_indices = @transform_0, window_bounds = array<i64: 2, 64, 1024>}, {transform_indices = @transform_1, window_bounds = array<i64: 2, 2, 64>}]} {
    %c0 = arith.constant 0 : index
    %c0_0 = arith.constant 0 : index
    %c0_1 = arith.constant 0 : index
    %0 = vector.load %arg1[%c0, %c0_0, %c0_1] : memref<2x64x1024xf32, #tpu.memory_space<vmem>>, vector<2x64x1024xf32>
    %cst = arith.constant dense<0.000000e+00> : vector<2x64xf32>
    %1 = vector.multi_reduction <add>, %0, %cst [2] : vector<2x64x1024xf32> to vector<2x64xf32>
    %2 = vector.shape_cast %1 : vector<2x64xf32> to vector<2x64x1xf32>
    %cst_2 = arith.constant 9.765625E-4 : f32
    %3 = vector.broadcast %cst_2 : f32 to vector<2x64x1xf32>
    %4 = arith.mulf %2, %3 : vector<2x64x1xf32>
    %5 = vector.broadcast %4 : vector<2x64x1xf32> to vector<2x64x1024xf32>
    %6 = arith.subf %0, %5 : vector<2x64x1024xf32>
    %7 = arith.mulf %6, %6 : vector<2x64x1024xf32>
    %cst_3 = arith.constant dense<0.000000e+00> : vector<2x64xf32>
    %8 = vector.multi_reduction <add>, %7, %cst_3 [2] : vector<2x64x1024xf32> to vector<2x64xf32>
    %9 = vector.shape_cast %8 : vector<2x64xf32> to vector<2x64x1xf32>
    %cst_4 = arith.constant 9.765625E-4 : f32
    %10 = vector.broadcast %cst_4 : f32 to vector<2x64x1xf32>
    %11 = arith.mulf %9, %10 : vector<2x64x1xf32>
    %cst_5 = arith.constant 9.99999993E-9 : f32
    %12 = vector.broadcast %cst_5 : f32 to vector<2x64x1xf32>
    %13 = arith.addf %11, %12 : vector<2x64x1xf32>
    %14 = math.sqrt %13 : vector<2x64x1xf32>
    %15 = vector.shape_cast %4 : vector<2x64x1xf32> to vector<2x64xf32>
    %16 = vector.shape_cast %15 : vector<2x64xf32> to vector<2x1x64xf32>
    %c0_6 = arith.constant 0 : index
    %c0_7 = arith.constant 0 : index
    %c0_8 = arith.constant 0 : index
    %17 = vector.load %arg2[%c0_6, %c0_7, %c0_8] : memref<2x2x64xf32, #tpu.memory_space<vmem>>, vector<2x1x64xf32>
    tpu.vector_store %arg2[%c0_6, %c0_7, %c0_8], %16 {strides = array<i32>} : memref<2x2x64xf32, #tpu.memory_space<vmem>>, vector<2x1x64xf32>,
    %18 = vector.shape_cast %14 : vector<2x64x1xf32> to vector<2x64xf32>
    %19 = vector.shape_cast %18 : vector<2x64xf32> to vector<2x1x64xf32>
    %c0_9 = arith.constant 0 : index
    %c1 = arith.constant 1 : index
    %c0_10 = arith.constant 0 : index
    %20 = vector.load %arg2[%c0_9, %c1, %c0_10] : memref<2x2x64xf32, #tpu.memory_space<vmem>>, vector<2x1x64xf32>
    tpu.vector_store %arg2[%c0_9, %c1, %c0_10], %19 {strides = array<i32>} : memref<2x2x64xf32, #tpu.memory_space<vmem>>, vector<2x1x64xf32>,
    return
  }
  func.func @transform_0(%arg0: i32) -> (i32, i32, i32) {
    %c0_i32 = arith.constant 0 : i32
    %c0_i32_0 = arith.constant 0 : i32
    %c0_i32_1 = arith.constant 0 : i32
    return %arg0, %c0_i32, %c0_i32_0 : i32, i32, i32
  }
  func.func @transform_1(%arg0: i32) -> (i32, i32, i32) {
    %c0_i32 = arith.constant 0 : i32
    %c0_i32_0 = arith.constant 0 : i32
    %c0_i32_1 = arith.constant 0 : i32
    return %arg0, %c0_i32, %c0_i32_0 : i32, i32, i32
  }
}

</mosaic_0001>

<bundles_post_ra>
// kernel: tpu_custom_call.1
= control target key start
LH: loop header
LB: loop body
LE: loop exit
PB: predicated region body
PF: predicated region fallthrough
CT: control target
= control target key end

     0   :  { %6 = vsyncpa [#allocation3], 0  ;;  %s2138_s0 = inlined_call_operand.hbm [shape: f32[2,64,1024], index: 0, kind: input, shape index: {}]   ;;  %s2139_s1 = inlined_call_operand.hbm [shape: f32[2,2,64], index: 1, kind: output, shape index: {}]  }
   0x1   :  { %7 = vsyncpa [#allocation4], 0  ;;  %s1171_s6 = smov [#allocation2]   ;;  %s1123_s10 = scalar_lea.hbm %s2138_s0, 16384 }
   0x2   :  { %s13_s7 = sshll.u32 %s1171_s6, 4  ;;  %p1124_p0 = scmp.ne.s32.totalorder %s2138_s0, %s1123_s10  ;;  %s14_s7 = int_to_ptr.vmem [resolvable:$true] %s13_s7 }
   0x3   :  { %p1127_p1 = scmp.lt.u32.totalorder %s1123_s10, %s2138_s0 }
   0x5   :  { %p1129_p2 = pnand %p1127_p1, %p1124_p0 }
   0x7   :  { %1132 = shalt.err (!%p1129_p2)
}
   0x8   :  { %s1133_s15 = scalar_lea.vmem %s14_s7, 16384  ;;  %p1138_p4 = scmp.lt.s32.totalorder %s14_s7, %s14_s7 }
   0x9   :  { %p1134_p3 = scmp.ne.s32.totalorder %s14_s7, %s1133_s15  ;;  %p1139_p5 = scmp.lt.s32.totalorder %s1133_s15, %s1133_s15 }
   0xb   :  { %p1140_p6 = por %p1139_p5, %p1138_p4 }
   0xd   :  { %p1141_p7 = pnand %p1140_p6, %p1134_p3 }
   0xf   :  { %1144 = shalt.err (!%p1141_p7)
}
  0x10   :  { %s1172_s16 = smov 1024   ;;  %s1173_s17 = smov 64  }
  0x11   :  { %19 = dma.hbm_to_vmem [thread:$0]  %s2138_s0, 16384, %s14_s7, [#allocation3], %s1172_s16, %s1172_s16, %s1173_s17  }
  0x12   :  { %1167 = dma.done.wait [#allocation3], 16384  }
  0x13   :  { %1168 = vsyncadd [#allocation3], 4294950912  ;;  %v1199_v0 = vld [vmem:[#allocation2 + $0x200] sm:$0xff]  ;;  %v1201_v1 = vld [vmem:[#allocation2 + $0x208] sm:$0xff]  ;;  %vm882_vm0 = vcmask 130112   ;;  %vm889_vm1 = vcmask 195712  }
  0x14   :  { %v1203_v2 = vld [vmem:[#allocation2 + $0x210] sm:$0xff]  ;;  %v223_v3 = vadd.f32 %v1201_v1, %v1199_v0  ;;  %v1207_v4 = vld [vmem:[#allocation2 + $0x218] sm:$0xff]  ;;  %v1209_v5 = vld [vmem:[#allocation2] sm:$0xff]  ;;  %vm896_vm2 = vcmask 261312   ;;  %vm903_vm3 = vcmask 326912   ;;  %vm910_vm4 = vcmask 392512  }
  0x15   :  { %v1212_v7 = vld [vmem:[#allocation2 + $0x8] sm:$0xff]  ;;  %v1214_v8 = vld [vmem:[#allocation2 + $0x10] sm:$0xff]  ;;  %v1216_v9 = vld [vmem:[#allocation2 + $0x220] sm:$0xff]  ;;  %vm917_vm5 = vcmask 458112   ;;  %vm924_vm6 = vcmask 523712   ;;  %vm967_vm7 = vcmask 516096  }
  0x16   :  { %v224_v6 = vadd.f32 %v223_v3, %v1203_v2  ;;  %v151_v10 = vadd.f32 %v1212_v7, %v1209_v5  ;;  %v1221_v12 = vld [vmem:[#allocation2 + $0x18] sm:$0xff]  ;;  %v1223_v13 = vld [vmem:[#allocation2 + $0x240] sm:$0xff]  ;;  %v1225_v14 = vld [vmem:[#allocation2 + $0x248] sm:$0xff]  ;;  %s1174_s0 = smov [#allocation5]  }
  0x17   :  { %v1227_v15 = vld [vmem:[#allocation2 + $0x228] sm:$0xff]  ;;  %v1230_v17 = vld [vmem:[#allocation2 + $0x250] sm:$0xff]  ;;  %v232_v18 = vadd.f32 %v1225_v14, %v1223_v13  ;;  %v1237_v21 = vld [vmem:[#allocation2 + $0x20] sm:$0xff]  ;;  %s1073_s20 = sshll.u32 %s1174_s0, 4  ;;  %s1074_s20 = int_to_ptr.vmem [resolvable:$true] %s1073_s20 }
  0x18   :  { %v225_v11 = vadd.f32 %v224_v6, %v1207_v4  ;;  %v152_v16 = vadd.f32 %v151_v10, %v1214_v8  ;;  %v1234_v19 = vld [vmem:[#allocation2 + $0x230] sm:$0xff]  ;;  %v1239_v22 = vld [vmem:[#allocation2 + $0x258] sm:$0xff]  ;;  %v1243_v25 = vld [vmem:[#allocation2 + $0x40] sm:$0xff]  ;;  %s1145_s21 = scalar_lea.vmem %s1074_s20, 64  ;;  %p1150_p9 = scmp.lt.s32.totalorder %s1074_s20, %s1074_s20 }
  0x19   :  { %v233_v24 = vadd.f32 %v232_v18, %v1230_v17  ;;  %v1245_v26 = vld [vmem:[#allocation2 + $0x48] sm:$0xff]  ;;  %v1247_v27 = vld [vmem:[#allocation2 + $0x50] sm:$0xff]  ;;  %v1249_v28 = vld [vmem:[#allocation2 + $0x238] sm:$0xff]  ;;  %p1146_p8 = scmp.ne.s32.totalorder %s1074_s20, %s1145_s21  ;;  %p1151_p10 = scmp.lt.s32.totalorder %s1145_s21, %s1145_s21 }
  0x1a   :  { %v226_v20 = vadd.f32 %v225_v11, %v1216_v9  ;;  %v153_v23 = vadd.f32 %v152_v16, %v1221_v12  ;;  %v1252_v30 = vld [vmem:[#allocation2 + $0x28] sm:$0xff]  ;;  %v1254_v31 = vld [vmem:[#allocation2 + $0x260] sm:$0xff]  ;;  %v160_v32 = vadd.f32 %v1245_v26, %v1243_v25  ;;  %v1258_v33 = vld [vmem:[#allocation2 + $0x30] sm:$0xff] }
  0x1b   :  { %v234_v35 = vadd.f32 %v233_v24, %v1239_v22  ;;  %v1262_v36 = vld [vmem:[#allocation2 + $0x58] sm:$0xff]  ;;  %v1264_v37 = vld [vmem:[#allocation2 + $0x280] sm:$0xff]  ;;  %v1267_v39 = vld [vmem:[#allocation2 + $0x268] sm:$0xff]  ;;  %p1152_p11 = por %p1151_p10, %p1150_p9 }
  0x1c   :  { %v227_v29 = vadd.f32 %v226_v20, %v1227_v15  ;;  %v154_v34 = vadd.f32 %v153_v23, %v1237_v21  ;;  %2235 = vst [vmem:[#allocation8_spill] sm:$0xff] %v1264_v37  ;;  %v161_v40 = vadd.f32 %v160_v32, %v1247_v27  ;;  %v1270_v41 = vld [vmem:[#allocation2 + $0x288] sm:$0xff]  ;;  %v1272_v42 = vld [vmem:[#allocation2 + $0x290] sm:$0xff]  ;;  %v1274_v43 = vld [vmem:[#allocation2 + $0x38] sm:$0xff] }
  0x1d   :  { %2236 = vst [vmem:[#allocation9_spill] sm:$0xff] %v1270_v41  ;;  %2237 = vst [vmem:[#allocation10_spill] sm:$0xff] %v1272_v42  ;;  %v1277_v45 = vld [vmem:[#allocation2 + $0x270] sm:$0xff]  ;;  %v235_v46 = vadd.f32 %v234_v35, %v1254_v31  ;;  %v1280_v47 = vld [vmem:[#allocation2 + $0x60] sm:$0xff]  ;;  %v241_v48 = vadd.f32 %v1270_v41, %v1264_v37  ;;  %p1153_p12 = pnand %p1152_p11, %p1146_p8 }
  0x1e   :  { %v228_v38 = vadd.f32 %v227_v29, %v1234_v19  ;;  %v155_v44 = vadd.f32 %v154_v34, %v1252_v30  ;;  %v162_v50 = vadd.f32 %v161_v40, %v1262_v36  ;;  %v1286_v51 = vld [vmem:[#allocation2 + $0x298] sm:$0xff]  ;;  %v1288_v52 = vld [vmem:[#allocation2 + $0x80] sm:$0xff]  ;;  %v1290_v53 = vld [vmem:[#allocation2 + $0x88] sm:$0xff] }
  0x1f   :  { %2238 = vst [vmem:[#allocation11_spill] sm:$0xff] %v1286_v51  ;;  %v1293_v55 = vld [vmem:[#allocation2 + $0x278] sm:$0xff]  ;;  %v236_v56 = vadd.f32 %v235_v46, %v1267_v39  ;;  %v1296_v57 = vld [vmem:[#allocation2 + $0x68] sm:$0xff]  ;;  %v242_v58 = vadd.f32 %v241_v48, %v1272_v42  ;;  %v1299_v59 = vld [vmem:[#allocation2 + $0x90] sm:$0xff]  ;;  %v169_v60 = vadd.f32 %v1290_v53, %v1288_v52 }
  0x20   :  { %v229_v49 = vadd.f32 %v228_v38, %v1249_v28  ;;  %v156_v54 = vadd.f32 %v155_v44, %v1258_v33  ;;  %v1303_v61 = vld [vmem:[#allocation2 + $0x70] sm:$0xff]  ;;  %v163_v62 = vadd.f32 %v162_v50, %v1280_v47  ;;  %v1306_v63 = vld [vmem:[#allocation2 + $0x2a0] sm:$0xff]  ;;  %v1308_v3 = vld [vmem:[#allocation2 + $0x98] sm:$0xff] }
  0x21   :  { %2239 = vst [vmem:[#allocation12_spill] sm:$0xff] %v1306_v63  ;;  %v237_v10 = vadd.f32 %v236_v56, %v1277_v45  ;;  %v243_v11 = vadd.f32 %v242_v58, %v1286_v51  ;;  %v170_v16 = vadd.f32 %v169_v60, %v1299_v59  ;;  %v1314_v18 = vld [vmem:[#allocation2 + $0x2c0] sm:$0xff]  ;;  %v1316_v20 = vld [vmem:[#allocation2 + $0x2c8] sm:$0xff]  ;;  %v1318_v23 = vld [vmem:[#allocation2 + $0x2d0] sm:$0xff] }
  0x22   :  { %230 = vadd.xlane.f32.xlu1 %v229_v49  ;;  %v157_v6 = vadd.f32 %v156_v54, %v1274_v43  ;;  %2240 = vst [vmem:[#allocation13_spill] sm:$0xff] %v1314_v18  ;;  %2241 = vst [vmem:[#allocation14_spill] sm:$0xff] %v1316_v20  ;;  %v1320_v24 = vld [vmem:[#allocation2 + $0x78] sm:$0xff]  ;;  %v164_v29 = vadd.f32 %v163_v62, %v1296_v57  ;;  %v1323_v32 = vld [vmem:[#allocation2 + $0x2a8] sm:$0xff]  ;;  %v250_v35 = vadd.f32 %v1316_v20, %v1314_v18 }
  0x23   :  { %2242 = vst [vmem:[#allocation15_spill] sm:$0xff] %v1318_v23  ;;  %2243 = vst [vmem:[#allocation16_spill] sm:$0xff] %v1323_v32  ;;  %v1325_v34 = vld [vmem:[#allocation2 + $0xa0] sm:$0xff]  ;;  %v238_v38 = vadd.f32 %v237_v10, %v1293_v55  ;;  %v1330_v40 = vld [vmem:[#allocation2 + $0x2b0] sm:$0xff]  ;;  %v244_v44 = vadd.f32 %v243_v11, %v1306_v63  ;;  %v171_v46 = vadd.f32 %v170_v16, %v1308_v3 }
  0x24   :  { %158 = vadd.xlane.f32.xlu0 %v157_v6  ;;  %2244 = vst [vmem:[#allocation17_spill] sm:$0xff] %v1330_v40  ;;  %v1334_v48 = vld [vmem:[#allocation2 + $0x2d8] sm:$0xff]  ;;  %v1336_v49 = vld [vmem:[#allocation2 + $0xc0] sm:$0xff]  ;;  %v165_v50 = vadd.f32 %v164_v29, %v1303_v61  ;;  %v1339_v54 = vld [vmem:[#allocation2 + $0xa8] sm:$0xff]  ;;  %v251_v56 = vadd.f32 %v250_v35, %v1318_v23 }
  0x25   :  { %2245 = vst [vmem:[#allocation18_spill] sm:$0xff] %v1334_v48  ;;  %2246 = vst [vmem:[#allocation19_spill] sm:$0xff] %v1336_v49  ;;  %v1342_v58 = vld [vmem:[#allocation2 + $0xc8] sm:$0xff]  ;;  %v1344_v60 = vld [vmem:[#allocation2 + $0xd0] sm:$0xff]  ;;  %v245_v6 = vadd.f32 %v244_v44, %v1323_v32  ;;  %v172_v11 = vadd.f32 %v171_v46, %v1325_v34 }
  0x26   :  { %2247 = vst [vmem:[#allocation20_spill] sm:$0xff] %v1342_v58  ;;  %2248 = vst [vmem:[#allocation21_spill] sm:$0xff] %v1344_v60  ;;  %239 = vadd.xlane.f32.xlu1 %v238_v38  ;;  %v1346_v62 = vld [vmem:[#allocation2 + $0x2b8] sm:$0xff]  ;;  %v1349_v10 = vld [vmem:[#allocation2 + $0xb0] sm:$0xff]  ;;  %v178_v29 = vadd.f32 %v1342_v58, %v1336_v49  ;;  %v166_v35 = vadd.f32 %v165_v50, %v1320_v24  ;;  %v252_v23 = vadd.f32 %v251_v56, %v1334_v48 }
  0x27   :  { %2249 = vst [vmem:[#allocation22_spill] sm:$0xff] %v1346_v62  ;;  %v1352_v16 = vld [vmem:[#allocation2 + $0x2e0] sm:$0xff]  ;;  %v1358_v20 = vld [vmem:[#allocation2 + $0xd8] sm:$0xff]  ;;  %v1362_v18 = vld [vmem:[#allocation2 + $0x308] sm:$0xff]  ;;  %v246_v44 = vadd.f32 %v245_v6, %v1330_v40  ;;  %v173_v46 = vadd.f32 %v172_v11, %v1339_v54 }
  0x28   :  { %2250 = vst [vmem:[#allocation23_spill] sm:$0xff] %v1352_v16  ;;  %2251 = vst [vmem:[#allocation24_spill] sm:$0xff] %v1358_v20  ;;  %v1360_v38 = vld [vmem:[#allocation2 + $0x300] sm:$0xff]  ;;  %v1365_v32 = vld [vmem:[#allocation2 + $0xb8] sm:$0xff]  ;;  %v179_v58 = vadd.f32 %v178_v29, %v1344_v60  ;;  %167 = vadd.xlane.f32.xlu0 %v166_v35  ;;  %v253_v48 = vadd.f32 %v252_v23, %v1352_v16 }
  0x29   :  { %2252 = vst [vmem:[#allocation25_spill] sm:$0xff] %v1360_v38  ;;  %2253 = vst [vmem:[#allocation26_spill] sm:$0xff] %v1362_v18  ;;  %v1368_v63 = vld [vmem:[#allocation2 + $0x2e8] sm:$0xff]  ;;  %v1371_v49 = vld [vmem:[#allocation2 + $0x310] sm:$0xff]  ;;  %v259_v50 = vadd.f32 %v1362_v18, %v1360_v38  ;;  %v247_v11 = vadd.f32 %v246_v44, %v1346_v62  ;;  %v174_v40 = vadd.f32 %v173_v46, %v1349_v10 }
  0x2a   :  { %2254 = vst [vmem:[#allocation27_spill] sm:$0xff] %v1365_v32  ;;  %2255 = vst [vmem:[#allocation28_spill] sm:$0xff] %v1368_v63  ;;  %v1375_v56 = vld [vmem:[#allocation2 + $0x2f0] sm:$0xff]  ;;  %v1378_v51 = vld [vmem:[#allocation2 + $0xe0] sm:$0xff]  ;;  %v180_v29 = vadd.f32 %v179_v58, %v1358_v20  ;;  %v254_v23 = vadd.f32 %v253_v48, %v1368_v63 }
  0x2b   :  { %2256 = vst [vmem:[#allocation29_spill] sm:$0xff] %v1371_v49  ;;  %2257 = vst [vmem:[#allocation30_spill] sm:$0xff] %v1375_v56  ;;  %v1380_v6 = vld [vmem:[#allocation2 + $0x318] sm:$0xff]  ;;  %v260_v60 = vadd.f32 %v259_v50, %v1371_v49  ;;  %v1386_v42 = vld [vmem:[#allocation2 + $0x100] sm:$0xff]  ;;  %248 = vadd.xlane.f32.xlu1 %v247_v11  ;;  %v175_v58 = vadd.f32 %v174_v40, %v1365_v32 }
  0x2c   :  { %2258 = vst [vmem:[#allocation31_spill] sm:$0xff] %v1378_v51  ;;  %2259 = vst [vmem:[#allocation32_spill] sm:$0xff] %v1380_v6  ;;  %v1388_v18 = vld [vmem:[#allocation2 + $0x108] sm:$0xff]  ;;  %v1390_v35 = vld [vmem:[#allocation2 + $0x110] sm:$0xff]  ;;  %v181_v50 = vadd.f32 %v180_v29, %v1378_v51  ;;  %v255_v48 = vadd.f32 %v254_v23, %v1375_v56 }
  0x2d   :  { %2260 = vst [vmem:[#allocation33_spill] sm:$0xff] %v1386_v42  ;;  %2261 = vst [vmem:[#allocation34_spill] sm:$0xff] %v1388_v18  ;;  %v1392_v38 = vld [vmem:[#allocation2 + $0x2f8] sm:$0xff]  ;;  %v1395_v16 = vld [vmem:[#allocation2 + $0xe8] sm:$0xff]  ;;  %v187_v44 = vadd.f32 %v1388_v18, %v1386_v42  ;;  %v261_v49 = vadd.f32 %v260_v60, %v1380_v6  ;;  %176 = vadd.xlane.f32.xlu0 %v175_v58 }
  0x2e   :  { %2262 = vst [vmem:[#allocation35_spill] sm:$0xff] %v1390_v35  ;;  %2263 = vst [vmem:[#allocation36_spill] sm:$0xff] %v1392_v38  ;;  %v1397_v41 = vld [vmem:[#allocation2 + $0x320] sm:$0xff]  ;;  %v1402_v46 = vld [vmem:[#allocation2 + $0xf0] sm:$0xff]  ;;  %v182_v29 = vadd.f32 %v181_v50, %v1395_v16 }
  0x2f   :  { %2264 = vst [vmem:[#allocation37_spill] sm:$0xff] %v1395_v16  ;;  %2265 = vst [vmem:[#allocation38_spill] sm:$0xff] %v1397_v41  ;;  %v1406_v20 = vld [vmem:[#allocation2 + $0x118] sm:$0xff]  ;;  %v1408_v62 = vld [vmem:[#allocation2 + $0x340] sm:$0xff]  ;;  %v188_v37 = vadd.f32 %v187_v44, %v1390_v35  ;;  %v262_v6 = vadd.f32 %v261_v49, %v1397_v41  ;;  %v256_v44 = vadd.f32 %v255_v48, %v1392_v38 }
  0x30   :  { %2266 = vst [vmem:[#allocation39_spill] sm:$0xff] %v1402_v46  ;;  %2267 = vst [vmem:[#allocation40_spill] sm:$0xff] %v1406_v20  ;;  %v1411_v63 = vld [vmem:[#allocation2 + $0x328] sm:$0xff]  ;;  %v1416_v11 = vld [vmem:[#allocation2 + $0x350] sm:$0xff]  ;;  %v183_v50 = vadd.f32 %v182_v29, %v1402_v46 }
  0x31   :  { %2268 = vst [vmem:[#allocation41_spill] sm:$0xff] %v1408_v62  ;;  %2269 = vst [vmem:[#allocation42_spill] sm:$0xff] %v1411_v63  ;;  %v1414_v18 = vld [vmem:[#allocation2 + $0x348] sm:$0xff]  ;;  %v1418_v40 = vld [vmem:[#allocation2 + $0xf8] sm:$0xff]  ;;  %v189_v35 = vadd.f32 %v188_v37, %v1406_v20  ;;  %v263_v49 = vadd.f32 %v262_v6, %v1411_v63  ;;  %257 = vadd.xlane.f32.xlu1 %v256_v44 }
  0x32   :  { %2270 = vst [vmem:[#allocation43_spill] sm:$0xff] %v1414_v18  ;;  %2271 = vst [vmem:[#allocation44_spill] sm:$0xff] %v1416_v11  ;;  %v1421_v60 = vld [vmem:[#allocation2 + $0x330] sm:$0xff]  ;;  %v1424_v42 = vld [vmem:[#allocation2 + $0x120] sm:$0xff]  ;;  %v268_v23 = vadd.f32 %v1414_v18, %v1408_v62  ;;  %v184_v6 = vadd.f32 %v183_v50, %v1418_v40 }
  0x33   :  { %2272 = vst [vmem:[#allocation45_spill] sm:$0xff] %v1418_v40  ;;  %2273 = vst [vmem:[#allocation46_spill] sm:$0xff] %v1421_v60  ;;  %v1430_v56 = vld [vmem:[#allocation2 + $0x358] sm:$0xff]  ;;  %v1432_v58 = vld [vmem:[#allocation2 + $0x140] sm:$0xff]  ;;  %v190_v20 = vadd.f32 %v189_v35, %v1424_v42  ;;  %v264_v63 = vadd.f32 %v263_v49, %v1421_v60 }
  0x34   :  { %2274 = vst [vmem:[#allocation47_spill] sm:$0xff] %v1424_v42  ;;  %2275 = vst [vmem:[#allocation48_spill] sm:$0xff] %v1430_v56  ;;  %v1434_v51 = vld [vmem:[#allocation2 + $0x148] sm:$0xff]  ;;  %v1437_v16 = vld [vmem:[#allocation2 + $0x338] sm:$0xff]  ;;  %v269_v18 = vadd.f32 %v268_v23, %v1416_v11  ;;  %185 = vadd.xlane.f32.xlu0 %v184_v6 }
  0x35   :  { %2276 = vst [vmem:[#allocation49_spill] sm:$0xff] %v1432_v58  ;;  %2277 = vst [vmem:[#allocation50_spill] sm:$0xff] %v1434_v51  ;;  %v1440_v41 = vld [vmem:[#allocation2 + $0x128] sm:$0xff]  ;;  %v1443_v62 = vld [vmem:[#allocation2 + $0x150] sm:$0xff]  ;;  %v196_v37 = vadd.f32 %v1434_v51, %v1432_v58 }
  0x36   :  { %2278 = vst [vmem:[#allocation51_spill] sm:$0xff] %v1437_v16  ;;  %2279 = vst [vmem:[#allocation52_spill] sm:$0xff] %v1440_v41  ;;  %v1447_v48 = vld [vmem:[#allocation2 + $0x130] sm:$0xff]  ;;  %v1450_v38 = vld [vmem:[#allocation2 + $0x360] sm:$0xff]  ;;  %v270_v23 = vadd.f32 %v269_v18, %v1430_v56  ;;  %v191_v35 = vadd.f32 %v190_v20, %v1440_v41  ;;  %v265_v18 = vadd.f32 %v264_v63, %v1437_v16 }
  0x37   :  { %2280 = vst [vmem:[#allocation53_spill] sm:$0xff] %v1443_v62  ;;  %2281 = vst [vmem:[#allocation54_spill] sm:$0xff] %v1450_v38  ;;  %v1452_v29 = vld [vmem:[#allocation2 + $0x158] sm:$0xff]  ;;  %v197_v11 = vadd.f32 %v196_v37, %v1443_v62  ;;  %v1458_v46 = vld [vmem:[#allocation2 + $0x380] sm:$0xff] }
  0x38   :  { %2282 = vst [vmem:[#allocation55_spill] sm:$0xff] %v1452_v29  ;;  %2283 = vst [vmem:[#allocation56_spill] sm:$0xff] %v1458_v46  ;;  %v1460_v51 = vld [vmem:[#allocation2 + $0x388] sm:$0xff]  ;;  %v1462_v44 = vld [vmem:[#allocation2 + $0x390] sm:$0xff]  ;;  %v271_v37 = vadd.f32 %v270_v23, %v1450_v38  ;;  %v192_v20 = vadd.f32 %v191_v35, %v1447_v48  ;;  %266 = vadd.xlane.f32.xlu1 %v265_v18 }
  0x39   :  { %2284 = vst [vmem:[#allocation57_spill] sm:$0xff] %v1460_v51  ;;  %2285 = vst [vmem:[#allocation58_spill] sm:$0xff] %v1462_v44  ;;  %v1464_v58 = vld [vmem:[#allocation2 + $0x138] sm:$0xff]  ;;  %v1467_v42 = vld [vmem:[#allocation2 + $0x368] sm:$0xff]  ;;  %v277_v50 = vadd.f32 %v1460_v51, %v1458_v46  ;;  %v198_v56 = vadd.f32 %v197_v11, %v1452_v29 }
  0x3a   :  { %2286 = vst [vmem:[#allocation59_spill] sm:$0xff] %v1464_v58  ;;  %2287 = vst [vmem:[#allocation60_spill] sm:$0xff] %v1467_v42  ;;  %v1469_v32 = vld [vmem:[#allocation2 + $0x160] sm:$0xff]  ;;  %v1474_v49 = vld [vmem:[#allocation2 + $0x370] sm:$0xff]  ;;  %v272_v23 = vadd.f32 %v271_v37, %v1467_v42 }
  0x3b   :  { %2288 = vst [vmem:[#allocation61_spill] sm:$0xff] %v1469_v32  ;;  %2289 = vst [vmem:[#allocation62_spill] sm:$0xff] %v1474_v49  ;;  %v1478_v62 = vld [vmem:[#allocation2 + $0x398] sm:$0xff]  ;;  %v1480_v60 = vld [vmem:[#allocation2 + $0x180] sm:$0xff]  ;;  %v278_v40 = vadd.f32 %v277_v50, %v1462_v44  ;;  %v199_v46 = vadd.f32 %v198_v56, %v1469_v32  ;;  %v193_v50 = vadd.f32 %v192_v20, %v1464_v58 }
  0x3c   :  { %2290 = vst [vmem:[#allocation63_spill] sm:$0xff] %v1478_v62  ;;  %2291 = vst [vmem:[#allocation64_spill] sm:$0xff] %v1480_v60  ;;  %v1483_v41 = vld [vmem:[#allocation2 + $0x168] sm:$0xff]  ;;  %v1488_v6 = vld [vmem:[#allocation2 + $0x190] sm:$0xff]  ;;  %v273_v37 = vadd.f32 %v272_v23, %v1474_v49 }
  0x3d   :  { %2292 = vst [vmem:[#allocation65_spill] sm:$0xff] %v1483_v41  ;;  %v1486_v51 = vld [vmem:[#allocation2 + $0x188] sm:$0xff]  ;;  %2294 = vst [vmem:[#allocation67_spill] sm:$0xff] %v1488_v6  ;;  %v1490_v63 = vld [vmem:[#allocation2 + $0x378] sm:$0xff]  ;;  %v279_v44 = vadd.f32 %v278_v40, %v1478_v62  ;;  %v200_v56 = vadd.f32 %v199_v46, %v1483_v41  ;;  %194 = vadd.xlane.f32.xlu0 %v193_v50 }
  0x3e   :  { %2293 = vst [vmem:[#allocation66_spill] sm:$0xff] %v1486_v51  ;;  %2295 = vst [vmem:[#allocation68_spill] sm:$0xff] %v1490_v63  ;;  %v1493_v11 = vld [vmem:[#allocation2 + $0x170] sm:$0xff]  ;;  %v1496_v38 = vld [vmem:[#allocation2 + $0x3a0] sm:$0xff]  ;;  %v205_v35 = vadd.f32 %v1486_v51, %v1480_v60  ;;  %v274_v46 = vadd.f32 %v273_v37, %v1490_v63 }
  0x3f   :  { %2296 = vst [vmem:[#allocation69_spill] sm:$0xff] %v1493_v11  ;;  %2297 = vst [vmem:[#allocation70_spill] sm:$0xff] %v1496_v38  ;;  %v1502_v29 = vld [vmem:[#allocation2 + $0x198] sm:$0xff]  ;;  %v1504_v18 = vld [vmem:[#allocation2 + $0x3c0] sm:$0xff]  ;;  %v280_v62 = vadd.f32 %v279_v44, %v1496_v38  ;;  %v201_v49 = vadd.f32 %v200_v56, %v1493_v11 }
  0x40   :  { %2298 = vst [vmem:[#allocation71_spill] sm:$0xff] %v1502_v29  ;;  %2299 = vst [vmem:[#allocation72_spill] sm:$0xff] %v1504_v18  ;;  %v1506_v16 = vld [vmem:[#allocation2 + $0x3c8] sm:$0xff]  ;;  %v1509_v42 = vld [vmem:[#allocation2 + $0x178] sm:$0xff]  ;;  %v206_v51 = vadd.f32 %v205_v35, %v1488_v6  ;;  %275 = vadd.xlane.f32.xlu1 %v274_v46 }
  0x41   :  { %2300 = vst [vmem:[#allocation73_spill] sm:$0xff] %v1506_v16  ;;  %v1512_v32 = vld [vmem:[#allocation2 + $0x3a8] sm:$0xff]  ;;  %v1515_v60 = vld [vmem:[#allocation2 + $0x3d0] sm:$0xff]  ;;  %v286_v40 = vadd.f32 %v1506_v16, %v1504_v18  ;;  %v1522_v58 = vld [vmem:[#allocation2 + $0x1a0] sm:$0xff] }
  0x42   :  { %2301 = vst [vmem:[#allocation74_spill] sm:$0xff] %v1512_v32  ;;  %2302 = vst [vmem:[#allocation75_spill] sm:$0xff] %v1515_v60  ;;  %v1519_v20 = vld [vmem:[#allocation2 + $0x3b0] sm:$0xff]  ;;  %v1524_v23 = vld [vmem:[#allocation2 + $0x3d8] sm:$0xff]  ;;  %v207_v35 = vadd.f32 %v206_v51, %v1502_v29  ;;  %v281_v44 = vadd.f32 %v280_v62, %v1512_v32  ;;  %v202_v51 = vadd.f32 %v201_v49, %v1509_v42 }
  0x43   :  { %2303 = vst [vmem:[#allocation76_spill] sm:$0xff] %v1519_v20  ;;  %2304 = vst [vmem:[#allocation77_spill] sm:$0xff] %v1524_v23  ;;  %v287_v6 = vadd.f32 %v286_v40, %v1515_v60  ;;  %v1530_v41 = vld [vmem:[#allocation2 + $0x1c0] sm:$0xff]  ;;  %v1532_v16 = vld [vmem:[#allocation2 + $0x1c8] sm:$0xff] }
  0x44   :  { %2305 = vst [vmem:[#allocation78_spill] sm:$0xff] %v1530_v41  ;;  %2306 = vst [vmem:[#allocation79_spill] sm:$0xff] %v1532_v16  ;;  %v1534_v50 = vld [vmem:[#allocation2 + $0x1d0] sm:$0xff]  ;;  %v1537_v18 = vld [vmem:[#allocation2 + $0x1a8] sm:$0xff]  ;;  %v214_v37 = vadd.f32 %v1532_v16, %v1530_v41  ;;  %v208_v40 = vadd.f32 %v207_v35, %v1522_v58  ;;  %v282_v62 = vadd.f32 %v281_v44, %v1519_v20  ;;  %203 = vadd.xlane.f32.xlu0 %v202_v51 }
  0x45   :  { %2307 = vst [vmem:[#allocation80_spill] sm:$0xff] %v1534_v50  ;;  %2308 = vst [vmem:[#allocation81_spill] sm:$0xff] %v1537_v18  ;;  %v1539_v38 = vld [vmem:[#allocation2 + $0x3e0] sm:$0xff]  ;;  %v1544_v56 = vld [vmem:[#allocation2 + $0x3b8] sm:$0xff]  ;;  %v288_v60 = vadd.f32 %v287_v6, %v1524_v23 }
  0x46   :  { %2309 = vst [vmem:[#allocation82_spill] sm:$0xff] %v1539_v38  ;;  %2310 = vst [vmem:[#allocation83_spill] sm:$0xff] %v1544_v56  ;;  %v1548_v29 = vld [vmem:[#allocation2 + $0x1d8] sm:$0xff]  ;;  %v1551_v32 = vld [vmem:[#allocation2 + $0x1b0] sm:$0xff]  ;;  %v215_v11 = vadd.f32 %v214_v37, %v1534_v50  ;;  %v209_v46 = vadd.f32 %v208_v40, %v1537_v18  ;;  %v283_v35 = vadd.f32 %v282_v62, %v1544_v56 }
  0x47   :  { %2311 = vst [vmem:[#allocation84_spill] sm:$0xff] %v1548_v29  ;;  %2312 = vst [vmem:[#allocation85_spill] sm:$0xff] %v1551_v32  ;;  %v1553_v63 = vld [vmem:[#allocation2 + $0x3e8] sm:$0xff]  ;;  %v289_v49 = vadd.f32 %v288_v60, %v1539_v38  ;;  %v1558_v16 = vld [vmem:[#allocation2 + $0x1e0] sm:$0xff] }
  0x48   :  { %2313 = vst [vmem:[#allocation86_spill] sm:$0xff] %v1553_v63  ;;  %2314 = vst [vmem:[#allocation87_spill] sm:$0xff] %v1558_v16  ;;  %v1561_v6 = vld [vmem:[#allocation2 + $0x1b8] sm:$0xff]  ;;  %v1563_v23 = vld [vmem:[#allocation2 + $0x3f0] sm:$0xff]  ;;  %v216_v44 = vadd.f32 %v215_v11, %v1548_v29  ;;  %v210_v41 = vadd.f32 %v209_v46, %v1551_v32  ;;  %284 = vadd.xlane.f32.xlu1 %v283_v35 }
  0x49   :  { %2315 = vst [vmem:[#allocation88_spill] sm:$0xff] %v1561_v6  ;;  %2316 = vst [vmem:[#allocation89_spill] sm:$0xff] %v1563_v23  ;;  %v290_v20 = vadd.f32 %v289_v49, %v1553_v63  ;;  %v1568_v37 = vld [vmem:[#allocation2 + $0x1e8] sm:$0xff]  ;;  %v1570_v51 = vld [vmem:[#allocation2 + $0x3f8] sm:$0xff] }
  0x4a   :  { %2317 = vst [vmem:[#allocation90_spill] sm:$0xff] %v1568_v37  ;;  %2318 = vst [vmem:[#allocation91_spill] sm:$0xff] %v1570_v51  ;;  %v217_v60 = vadd.f32 %v216_v44, %v1558_v16  ;;  %v211_v40 = vadd.f32 %v210_v41, %v1561_v6  ;;  %v1575_v38 = vld [vmem:[#allocation2 + $0x1f0] sm:$0xff]  ;;  %v1579_v46 = vld [vmem:[#allocation2 + $0x1f8] sm:$0xff]  ;;  %v871_v44 = vlaneseq }
  0x4b   :  { %v291_v62 = vadd.f32 %v290_v20, %v1563_v23  ;;  %2319 = vst [vmem:[#allocation92_spill] sm:$0xff] %v1575_v38  ;;  %2320 = vst [vmem:[#allocation93_spill] sm:$0xff] %v1579_v46 }
  0x4c   :  { %v218_v50 = vadd.f32 %v217_v60, %v1568_v37  ;;  %212 = vadd.xlane.f32.xlu0 %v211_v40  ;;  %v872_v63 = vand.u32 127, %v871_v44  ;;  %v874_v41 = vshrl.u32 %v871_v44, 7 }
  0x4d   :  { %v292_v11 = vadd.f32 %v291_v62, %v1570_v51 }
  0x4e   :  { %v219_v49 = vadd.f32 %v218_v50, %v1575_v38  ;;  %v877_v16 = vadd.s32 4294967288, %v872_v63  ;;  %v884_v20 = vadd.s32 4294967280, %v872_v63  ;;  %v891_v23 = vadd.s32 4294967272, %v872_v63 }
  0x4f   :  { %293 = vadd.xlane.f32.xlu1 %v292_v11  ;;  %v898_v29 = vadd.s32 4294967264, %v872_v63  ;;  %v905_v56 = vadd.s32 4294967256, %v872_v63  ;;  %v912_v60 = vadd.s32 4294967248, %v872_v63  ;;  %v919_v40 = vadd.s32 4294967240, %v872_v63 }
  0x50   :  { %v220_v35 = vadd.f32 %v219_v49, %v1579_v46  ;;  %v1585_v51 = vsub.s32 %v872_v63, %v874_v41  ;;  %v1587_v50 = vsub.s32 %v877_v16, %v874_v41  ;;  %v1589_v11 = vsub.s32 %v884_v20, %v874_v41 }
  0x51   :  { %v1591_v49 = vsub.s32 %v891_v23, %v874_v41  ;;  %v1595_v44 = vsub.s32 %v905_v56, %v874_v41  ;;  %v1597_v46 = vsub.s32 %v912_v60, %v874_v41 }
  0x52   :  { %221 = vadd.xlane.f32.xlu0 %v220_v35  ;;  %2322 = vst [vmem:[#allocation95_spill] sm:$0xff] %v1585_v51  ;;  %2323 = vst [vmem:[#allocation96_spill] sm:$0xff] %v1587_v50  ;;  %v1593_v35 = vsub.s32 %v898_v29, %v874_v41 }
  0x53   :  { %2324 = vst [vmem:[#allocation97_spill] sm:$0xff] %v1589_v11  ;;  %2325 = vst [vmem:[#allocation98_spill] sm:$0xff] %v1591_v49 }
  0x54   :  { %2326 = vst [vmem:[#allocation99_spill] sm:$0xff] %v1593_v35  ;;  %2327 = vst [vmem:[#allocation100_spill] sm:$0xff] %v1595_v44 }
  0x55   :  { %2328 = vst [vmem:[#allocation101_spill] sm:$0xff] %v1597_v46 }
  0xaf   :  { %v231_v37 = vpop.xlane.xlu1 %230 }
  0xb0   :  { %v1583_v62 = vmul.f32 0.0009765625, %v231_v37  ;;  %v1605_v37 = vsub.s32 %v919_v40, %v874_v41 }
  0xb1   :  { %v159_v38 = vpop.xlane.xlu0 %158 }
  0xb2   :  { %2321 = vst [vmem:[#allocation94_spill] sm:$0xff] %v1583_v62  ;;  %v375_v6 = vsub.f32 %v1199_v0, %v1583_v62  ;;  %v376_v63 = vsub.f32 %v1201_v1, %v1583_v62  ;;  %v377_v16 = vsub.f32 %v1203_v2, %v1583_v62  ;;  %2329 = vst [vmem:[#allocation102_spill] sm:$0xff] %v1605_v37  ;;  %v1607_v23 = vmul.f32 0.0009765625, %v159_v38 }
  0xb3   :  { %v378_v29 = vsub.f32 %v1207_v4, %v1583_v62  ;;  %v379_v56 = vsub.f32 %v1216_v9, %v1583_v62  ;;  %v380_v20 = vsub.f32 %v1227_v15, %v1583_v62  ;;  %v240_v0 = vpop.xlane.xlu1 %239  ;;  %v381_v1 = vsub.f32 %v1234_v19, %v1583_v62 }
  0xb4   :  { %v382_v2 = vsub.f32 %v1249_v28, %v1583_v62  ;;  %v503_v41 = vmul.f32 %v375_v6, %v375_v6  ;;  %v504_v60 = vmul.f32 %v376_v63, %v376_v63  ;;  %v311_v38 = vsub.f32 %v1209_v5, %v1607_v23 }
  0xb5   :  { %v312_v4 = vsub.f32 %v1212_v7, %v1607_v23  ;;  %v313_v9 = vsub.f32 %v1214_v8, %v1607_v23  ;;  %v505_v40 = vmul.f32 %v377_v16, %v377_v16  ;;  %v314_v15 = vsub.f32 %v1221_v12, %v1607_v23  ;;  %v168_v63 = vpop.xlane.xlu0 %167 }
  0xb6   :  { %v315_v19 = vsub.f32 %v1237_v21, %v1607_v23  ;;  %v316_v28 = vsub.f32 %v1252_v30, %v1607_v23  ;;  %v317_v6 = vsub.f32 %v1258_v33, %v1607_v23  ;;  %v1633_v5 = vmul.f32 0.0009765625, %v240_v0 }
  0xb7   :  { %v318_v7 = vsub.f32 %v1274_v43, %v1607_v23  ;;  %v439_v8 = vmul.f32 %v311_v38, %v311_v38  ;;  %v440_v16 = vmul.f32 %v312_v4, %v312_v4  ;;  %v1637_v62 = vmul.f32 0.0009765625, %v168_v63 }
  0xb8   :  { %v441_v12 = vmul.f32 %v313_v9, %v313_v9  ;;  %v442_v37 = vmul.f32 %v314_v15, %v314_v15  ;;  %v443_v46 = vmul.f32 %v315_v19, %v315_v19  ;;  %v444_v21 = vmul.f32 %v316_v28, %v316_v28  ;;  %v249_v49 = vpop.xlane.xlu1 %248 }
  0xb9   :  { %v445_v44 = vmul.f32 %v317_v6, %v317_v6  ;;  %v446_v35 = vmul.f32 %v318_v7, %v318_v7  ;;  %v567_v30 = vadd.f32 %v440_v16, %v439_v8  ;;  %v506_v11 = vmul.f32 %v378_v29, %v378_v29 }
  0xba   :  { %v507_v33 = vmul.f32 %v379_v56, %v379_v56  ;;  %v508_v0 = vmul.f32 %v380_v20, %v380_v20  ;;  %v509_v50 = vmul.f32 %v381_v1, %v381_v1  ;;  %v510_v32 = vmul.f32 %v382_v2, %v382_v2  ;;  %v177_v38 = vpop.xlane.xlu0 %176 }
  0xbb   :  { %v568_v51 = vadd.f32 %v567_v30, %v441_v12  ;;  %v639_v18 = vadd.f32 %v504_v60, %v503_v41  ;;  %v319_v43 = vsub.f32 %v1243_v25, %v1637_v62  ;;  %v320_v4 = vsub.f32 %v1245_v26, %v1637_v62 }
  0xbc   :  { %v321_v9 = vsub.f32 %v1247_v27, %v1637_v62  ;;  %v322_v15 = vsub.f32 %v1262_v36, %v1637_v62  ;;  %v323_v29 = vsub.f32 %v1280_v47, %v1637_v62  ;;  %v1649_v56 = vmul.f32 0.0009765625, %v249_v49 }
  0xbd   :  { %v569_v20 = vadd.f32 %v568_v51, %v442_v37  ;;  %v640_v1 = vadd.f32 %v639_v18, %v505_v40  ;;  %v324_v25 = vsub.f32 %v1296_v57, %v1637_v62  ;;  %v325_v2 = vsub.f32 %v1303_v61, %v1637_v62 }
  0xbe   :  { %v326_v26 = vsub.f32 %v1320_v24, %v1637_v62  ;;  %v447_v27 = vmul.f32 %v319_v43, %v319_v43  ;;  %v448_v41 = vmul.f32 %v320_v4, %v320_v4  ;;  %v1657_v60 = vmul.f32 0.0009765625, %v177_v38  ;;  %v258_v36 = vpop.xlane.xlu1 %257 }
  0xbf   :  { %v570_v19 = vadd.f32 %v569_v20, %v443_v46  ;;  %v641_v47 = vadd.f32 %v640_v1, %v506_v11  ;;  %v449_v49 = vmul.f32 %v321_v9, %v321_v9  ;;  %v1659_v28 = vmul.f32 0.0009765625, %v258_v36 }
  0xc0   :  { %v450_v18 = vmul.f32 %v322_v15, %v322_v15  ;;  %v451_v51 = vmul.f32 %v323_v29, %v323_v29  ;;  %v452_v37 = vmul.f32 %v324_v25, %v324_v25  ;;  %v453_v6 = vmul.f32 %v325_v2, %v325_v2 }
  0xc1   :  { %v571_v57 = vadd.f32 %v570_v19, %v444_v21  ;;  %v642_v40 = vadd.f32 %v641_v47, %v507_v33  ;;  %v576_v61 = vadd.f32 %v448_v41, %v447_v27  ;;  %v186_v63 = vpop.xlane.xlu0 %185  ;;  %v454_v7 = vmul.f32 %v326_v26, %v326_v26 }
  0xc2   :  { %v383_v24 = vsub.f32 %v1223_v13, %v1633_v5  ;;  %v384_v8 = vsub.f32 %v1225_v14, %v1633_v5  ;;  %v385_v46 = vsub.f32 %v1230_v17, %v1633_v5  ;;  %v386_v21 = vsub.f32 %v1239_v22, %v1633_v5 }
  0xc3   :  { %v572_v11 = vadd.f32 %v571_v57, %v445_v44  ;;  %v643_v16 = vadd.f32 %v642_v40, %v508_v0  ;;  %v577_v12 = vadd.f32 %v576_v61, %v449_v49  ;;  %v1669_v30 = vmul.f32 0.0009765625, %v186_v63 }
  0xc4   :  { %v387_v43 = vsub.f32 %v1254_v31, %v1633_v5  ;;  %v388_v13 = vsub.f32 %v1267_v39, %v1633_v5  ;;  %v389_v14 = vsub.f32 %v1277_v45, %v1633_v5  ;;  %v390_v0 = vsub.f32 %v1293_v55, %v1633_v5 }
  0xc5   :  { %v267_v33 = vpop.xlane.xlu1 %266  ;;  %v573_v38 = vadd.f32 %v572_v11, %v446_v35  ;;  %v644_v17 = vadd.f32 %v643_v16, %v509_v50  ;;  %v578_v44 = vadd.f32 %v577_v12, %v450_v18  ;;  %v511_v22 = vmul.f32 %v383_v24, %v383_v24 }
  0xc6   :  { %v1679_v4 = vmul.f32 0.0009765625, %v267_v33  ;;  %v512_v9 = vmul.f32 %v384_v8, %v384_v8  ;;  %v513_v15 = vmul.f32 %v385_v46, %v385_v46  ;;  %v514_v1 = vmul.f32 %v386_v21, %v386_v21  ;;  %v2332_v21 = vld [vmem:[#allocation9_spill] sm:$0xff] }
  0xc7   :  { %574 = vadd.xlane.f32.xlu0 %v573_v38  ;;  %v645_v31 = vadd.f32 %v644_v17, %v510_v32  ;;  %v579_v20 = vadd.f32 %v578_v44, %v451_v51  ;;  %v515_v39 = vmul.f32 %v387_v43, %v387_v43  ;;  %v516_v45 = vmul.f32 %v388_v13, %v388_v13  ;;  %v2333_v43 = vld [vmem:[#allocation10_spill] sm:$0xff]  ;;  %v2334_v38 = vld [vmem:[#allocation11_spill] sm:$0xff]  ;;  %v2335_v44 = vld [vmem:[#allocation12_spill] sm:$0xff] }
  0xc8   :  { %v517_v35 = vmul.f32 %v389_v14, %v389_v14  ;;  %v648_v50 = vadd.f32 %v512_v9, %v511_v22  ;;  %v327_v55 = vsub.f32 %v1288_v52, %v1657_v60  ;;  %v328_v26 = vsub.f32 %v1290_v53, %v1657_v60  ;;  %v2336_v9 = vld [vmem:[#allocation16_spill] sm:$0xff] }
  0xc9   :  { %v580_v2 = vadd.f32 %v579_v20, %v452_v37  ;;  %v329_v27 = vsub.f32 %v1299_v59, %v1657_v60  ;;  %v330_v36 = vsub.f32 %v1308_v3, %v1657_v60  ;;  %v331_v19 = vsub.f32 %v1325_v34, %v1657_v60  ;;  %v2330_v37 = vld [vmem:[#allocation27_spill] sm:$0xff]  ;;  %v2338_v20 = vld [vmem:[#allocation22_spill] sm:$0xff] }
  0xca   :  { %v195_v29 = vpop.xlane.xlu0 %194  ;;  %v649_v32 = vadd.f32 %v648_v50, %v513_v15  ;;  %v332_v47 = vsub.f32 %v1339_v54, %v1657_v60  ;;  %v518_v18 = vmul.f32 %v390_v0, %v390_v0  ;;  %v333_v53 = vsub.f32 %v1349_v10, %v1657_v60  ;;  %v2331_v10 = vld [vmem:[#allocation8_spill] sm:$0xff] }
  0xcb   :  { %v1681_v25 = vmul.f32 0.0009765625, %v195_v29  ;;  %646 = vadd.xlane.f32.xlu0 %v645_v31  ;;  %v581_v52 = vadd.f32 %v580_v2, %v453_v6  ;;  %v334_v57 = vsub.f32 %v2330_v37, %v1657_v60  ;;  %v455_v3 = vmul.f32 %v327_v55, %v327_v55  ;;  %v2337_v29 = vld [vmem:[#allocation17_spill] sm:$0xff] }
  0xcc   :  { %v650_v51 = vadd.f32 %v649_v32, %v514_v1  ;;  %v456_v40 = vmul.f32 %v328_v26, %v328_v26  ;;  %v457_v63 = vmul.f32 %v329_v27, %v329_v27  ;;  %v458_v54 = vmul.f32 %v330_v36, %v330_v36 }
  0xcd   :  { %v276_v41 = vpop.xlane.xlu1 %275  ;;  %v582_v34 = vadd.f32 %v581_v52, %v454_v7  ;;  %v459_v8 = vmul.f32 %v331_v19, %v331_v19  ;;  %v460_v46 = vmul.f32 %v332_v47, %v332_v47  ;;  %v461_v6 = vmul.f32 %v333_v53, %v333_v53 }
  0xce   :  { %v1695_v49 = vmul.f32 0.0009765625, %v276_v41  ;;  %v651_v24 = vadd.f32 %v650_v51, %v515_v39  ;;  %v585_v16 = vadd.f32 %v456_v40, %v455_v3  ;;  %v391_v12 = vsub.f32 %v2331_v10, %v1649_v56 }
  0xcf   :  { %583 = vadd.xlane.f32.xlu1 %v582_v34  ;;  %v392_v33 = vsub.f32 %v2332_v21, %v1649_v56  ;;  %v393_v13 = vsub.f32 %v2333_v43, %v1649_v56  ;;  %v462_v7 = vmul.f32 %v334_v57, %v334_v57  ;;  %v394_v17 = vsub.f32 %v2334_v38, %v1649_v56  ;;  %v2339_v57 = vld [vmem:[#allocation19_spill] sm:$0xff]  ;;  %v2341_v34 = vld [vmem:[#allocation21_spill] sm:$0xff] }
  0xd0   :  { %v652_v14 = vadd.f32 %v651_v24, %v516_v45  ;;  %v395_v0 = vsub.f32 %v2335_v44, %v1649_v56  ;;  %v586_v22 = vadd.f32 %v585_v16, %v457_v63  ;;  %v396_v15 = vsub.f32 %v2336_v9, %v1649_v56  ;;  %v2343_v24 = vld [vmem:[#allocation31_spill] sm:$0xff] }
  0xd1   :  { %v204_v59 = vpop.xlane.xlu0 %203  ;;  %v397_v31 = vsub.f32 %v2337_v29, %v1649_v56  ;;  %v398_v1 = vsub.f32 %v2338_v20, %v1649_v56  ;;  %v519_v2 = vmul.f32 %v391_v12, %v391_v12  ;;  %v520_v55 = vmul.f32 %v392_v33, %v392_v33  ;;  %v2344_v12 = vld [vmem:[#allocation37_spill] sm:$0xff]  ;;  %v2345_v33 = vld [vmem:[#allocation39_spill] sm:$0xff] }
  0xd2   :  { %v1701_v61 = vmul.f32 0.0009765625, %v204_v59  ;;  %v653_v50 = vadd.f32 %v652_v14, %v517_v35  ;;  %v587_v27 = vadd.f32 %v586_v22, %v458_v54  ;;  %v521_v41 = vmul.f32 %v393_v13, %v393_v13  ;;  %v2340_v35 = vld [vmem:[#allocation20_spill] sm:$0xff]  ;;  %v2346_v22 = vld [vmem:[#allocation45_spill] sm:$0xff] }
  0xd3   :  { %v522_v32 = vmul.f32 %v394_v17, %v394_v17  ;;  %v523_v19 = vmul.f32 %v395_v0, %v395_v0  ;;  %v524_v47 = vmul.f32 %v396_v15, %v396_v15  ;;  %v525_v52 = vmul.f32 %v397_v31, %v397_v31  ;;  %v2342_v54 = vld [vmem:[#allocation24_spill] sm:$0xff] }
  0xd4   :  { %v654_v36 = vadd.f32 %v653_v50, %v518_v18  ;;  %v588_v59 = vadd.f32 %v587_v27, %v459_v8  ;;  %v526_v51 = vmul.f32 %v398_v1, %v398_v1  ;;  %v657_v37 = vadd.f32 %v520_v55, %v519_v2  ;;  %v2347_v2 = vld [vmem:[#allocation13_spill] sm:$0xff]  ;;  %v2348_v27 = vld [vmem:[#allocation14_spill] sm:$0xff] }
  0xd5   :  { %v285_v11 = vpop.xlane.xlu1 %284  ;;  %v335_v3 = vsub.f32 %v2339_v57, %v1669_v30  ;;  %v336_v40 = vsub.f32 %v2340_v35, %v1669_v30  ;;  %v337_v63 = vsub.f32 %v2341_v34, %v1669_v30  ;;  %v338_v18 = vsub.f32 %v2342_v54, %v1669_v30  ;;  %v2353_v35 = vld [vmem:[#allocation30_spill] sm:$0xff] }
  0xd6   :  { %v1719_v39 = vmul.f32 0.0009765625, %v285_v11  ;;  %655 = vadd.xlane.f32.xlu1 %v654_v36  ;;  %v339_v11 = vsub.f32 %v2343_v24, %v1669_v30  ;;  %v589_v8 = vadd.f32 %v588_v59, %v460_v46  ;;  %v658_v10 = vadd.f32 %v657_v37, %v521_v41  ;;  %v2350_v36 = vld [vmem:[#allocation18_spill] sm:$0xff]  ;;  %v2351_v59 = vld [vmem:[#allocation23_spill] sm:$0xff] }
  0xd7   :  { %v340_v21 = vsub.f32 %v2344_v12, %v1669_v30  ;;  %v341_v43 = vsub.f32 %v2345_v33, %v1669_v30  ;;  %v463_v38 = vmul.f32 %v335_v3, %v335_v3  ;;  %v464_v17 = vmul.f32 %v336_v40, %v336_v40 }
  0xd8   :  { %v590_v44 = vadd.f32 %v589_v8, %v461_v6  ;;  %v659_v0 = vadd.f32 %v658_v10, %v522_v32  ;;  %v342_v9 = vsub.f32 %v2346_v22, %v1669_v30  ;;  %v465_v15 = vmul.f32 %v337_v63, %v337_v63  ;;  %v2349_v6 = vld [vmem:[#allocation15_spill] sm:$0xff] }
  0xd9   :  { %v213_v45 = vpop.xlane.xlu0 %212  ;;  %v466_v46 = vmul.f32 %v338_v18, %v338_v18  ;;  %v467_v29 = vmul.f32 %v339_v11, %v339_v11  ;;  %v468_v31 = vmul.f32 %v340_v21, %v340_v21  ;;  %v469_v20 = vmul.f32 %v341_v43, %v341_v43 }
  0xda   :  { %v1721_v26 = vmul.f32 0.0009765625, %v213_v45  ;;  %v591_v1 = vadd.f32 %v590_v44, %v462_v7  ;;  %v660_v45 = vadd.f32 %v659_v0, %v523_v19  ;;  %v594_v50 = vadd.f32 %v464_v17, %v463_v38  ;;  %v2352_v19 = vld [vmem:[#allocation28_spill] sm:$0xff]  ;;  %v2355_v17 = vld [vmem:[#allocation33_spill] sm:$0xff]  ;;  %v2356_v0 = vld [vmem:[#allocation34_spill] sm:$0xff] }
  0xdb   :  { %v399_v55 = vsub.f32 %v2347_v2, %v1659_v28  ;;  %v400_v41 = vsub.f32 %v2348_v27, %v1659_v28  ;;  %v401_v32 = vsub.f32 %v2349_v6, %v1659_v28  ;;  %v403_v37 = vsub.f32 %v2351_v59, %v1659_v28  ;;  %v2361_v59 = vld [vmem:[#allocation59_spill] sm:$0xff] }
  0xdc   :  { %v294_v53 = vpop.xlane.xlu1 %293  ;;  %592 = vadd.xlane.f32.xlu0 %v591_v1  ;;  %v661_v57 = vadd.f32 %v660_v45, %v524_v47  ;;  %v595_v7 = vadd.f32 %v594_v50, %v465_v15  ;;  %v404_v3 = vsub.f32 %v2352_v19, %v1659_v28  ;;  %v405_v40 = vsub.f32 %v2353_v35, %v1659_v28  ;;  %v2359_v45 = vld [vmem:[#allocation47_spill] sm:$0xff] }
  0xdd   :  { %v1737_v13 = vmul.f32 0.0009765625, %v294_v53  ;;  %v402_v53 = vsub.f32 %v2350_v36, %v1659_v28  ;;  %v470_v34 = vmul.f32 %v342_v9, %v342_v9  ;;  %v527_v63 = vmul.f32 %v399_v55, %v399_v55 }
  0xde   :  { %v528_v54 = vmul.f32 %v400_v41, %v400_v41  ;;  %v529_v18 = vmul.f32 %v401_v32, %v401_v32  ;;  %v662_v24 = vadd.f32 %v661_v57, %v525_v52  ;;  %v596_v11 = vadd.f32 %v595_v7, %v466_v46  ;;  %v2357_v52 = vld [vmem:[#allocation35_spill] sm:$0xff]  ;;  %v2358_v46 = vld [vmem:[#allocation40_spill] sm:$0xff] }
  0xdf   :  { %v222_v16 = vpop.xlane.xlu0 %221  ;;  %v530_v10 = vmul.f32 %v402_v53, %v402_v53  ;;  %v531_v12 = vmul.f32 %v403_v37, %v403_v37  ;;  %v532_v21 = vmul.f32 %v404_v3, %v404_v3  ;;  %v533_v47 = vmul.f32 %v405_v40, %v405_v40 }
  0xe0   :  { %v1739_v14 = vmul.f32 0.0009765625, %v222_v16  ;;  %v2354_v16 = vld [vmem:[#allocation36_spill] sm:$0xff]  ;;  %v666_v33 = vadd.f32 %v528_v54, %v527_v63  ;;  %v663_v43 = vadd.f32 %v662_v24, %v526_v51  ;;  %v597_v38 = vadd.f32 %v596_v11, %v467_v29  ;;  %v2362_v63 = vld [vmem:[#allocation25_spill] sm:$0xff] }
  0xe1   :  { %v406_v8 = vsub.f32 %v2354_v16, %v1659_v28  ;;  %v343_v44 = vsub.f32 %v2355_v17, %v1681_v25  ;;  %v344_v22 = vsub.f32 %v2356_v0, %v1681_v25  ;;  %v345_v15 = vsub.f32 %v2357_v52, %v1681_v25  ;;  %v2360_v29 = vld [vmem:[#allocation52_spill] sm:$0xff]  ;;  %v2364_v24 = vld [vmem:[#allocation29_spill] sm:$0xff]  ;;  %v2368_v17 = vld [vmem:[#allocation46_spill] sm:$0xff] }
  0xe2   :  { %v667_v9 = vadd.f32 %v666_v33, %v529_v18  ;;  %v346_v1 = vsub.f32 %v2358_v46, %v1681_v25  ;;  %v347_v50 = vsub.f32 %v2359_v45, %v1681_v25  ;;  %664 = vadd.xlane.f32.xlu1 %v663_v43  ;;  %v598_v2 = vadd.f32 %v597_v38, %v468_v31 }
  0xe3   :  { %v534_v51 = vmul.f32 %v406_v8, %v406_v8  ;;  %v348_v55 = vsub.f32 %v2360_v29, %v1681_v25  ;;  %v349_v27 = vsub.f32 %v1447_v48, %v1681_v25  ;;  %v471_v6 = vmul.f32 %v343_v44, %v343_v44  ;;  %v2363_v48 = vld [vmem:[#allocation26_spill] sm:$0xff]  ;;  %v2365_v8 = vld [vmem:[#allocation32_spill] sm:$0xff] }
  0xe4   :  { %v668_v41 = vadd.f32 %v667_v9, %v530_v10  ;;  %v472_v32 = vmul.f32 %v344_v22, %v344_v22  ;;  %v473_v36 = vmul.f32 %v345_v15, %v345_v15  ;;  %v599_v53 = vadd.f32 %v598_v2, %v469_v20  ;;  %v2369_v15 = vld [vmem:[#allocation51_spill] sm:$0xff] }
  0xe5   :  { %v350_v37 = vsub.f32 %v2361_v59, %v1681_v25  ;;  %v474_v57 = vmul.f32 %v346_v1, %v346_v1  ;;  %v475_v7 = vmul.f32 %v347_v50, %v347_v50  ;;  %v476_v3 = vmul.f32 %v348_v55, %v348_v55  ;;  %v2373_v59 = vld [vmem:[#allocation55_spill] sm:$0xff] }
  0xe6   :  { %v669_v19 = vadd.f32 %v668_v41, %v531_v12  ;;  %v477_v31 = vmul.f32 %v349_v27, %v349_v27  ;;  %v603_v35 = vadd.f32 %v472_v32, %v471_v6  ;;  %v600_v40 = vadd.f32 %v599_v53, %v470_v34  ;;  %v2366_v12 = vld [vmem:[#allocation38_spill] sm:$0xff]  ;;  %v2370_v41 = vld [vmem:[#allocation49_spill] sm:$0xff] }
  0xe7   :  { %v407_v54 = vsub.f32 %v2362_v63, %v1679_v4  ;;  %v408_v18 = vsub.f32 %v2363_v48, %v1679_v4  ;;  %v409_v11 = vsub.f32 %v2364_v24, %v1679_v4  ;;  %v410_v10 = vsub.f32 %v2365_v8, %v1679_v4  ;;  %v2367_v34 = vld [vmem:[#allocation42_spill] sm:$0xff] }
  0xe8   :  { %v670_v20 = vadd.f32 %v669_v19, %v532_v21  ;;  %v604_v16 = vadd.f32 %v603_v35, %v473_v36  ;;  %v411_v33 = vsub.f32 %v2366_v12, %v1679_v4  ;;  %601 = vadd.xlane.f32.xlu0 %v600_v40  ;;  %v478_v43 = vmul.f32 %v350_v37, %v350_v37  ;;  %v2371_v32 = vld [vmem:[#allocation50_spill] sm:$0xff]  ;;  %v2375_v35 = vld [vmem:[#allocation65_spill] sm:$0xff] }
  0xe9   :  { %v412_v38 = vsub.f32 %v2367_v34, %v1679_v4  ;;  %v413_v44 = vsub.f32 %v2368_v17, %v1679_v4  ;;  %v535_v0 = vmul.f32 %v407_v54, %v407_v54  ;;  %v536_v52 = vmul.f32 %v408_v18, %v408_v18  ;;  %v2376_v54 = vld [vmem:[#allocation69_spill] sm:$0xff] }
  0xea   :  { %v671_v22 = vadd.f32 %v670_v20, %v533_v47  ;;  %v605_v9 = vadd.f32 %v604_v16, %v474_v57  ;;  %v537_v21 = vmul.f32 %v409_v11, %v409_v11  ;;  %v414_v46 = vsub.f32 %v2369_v15, %v1679_v4  ;;  %v2372_v47 = vld [vmem:[#allocation53_spill] sm:$0xff]  ;;  %v2381_v15 = vld [vmem:[#allocation54_spill] sm:$0xff] }
  0xeb   :  { %v538_v1 = vmul.f32 %v410_v10, %v410_v10  ;;  %v539_v45 = vmul.f32 %v411_v33, %v411_v33  ;;  %v540_v50 = vmul.f32 %v412_v38, %v412_v38  ;;  %v541_v55 = vmul.f32 %v413_v44, %v413_v44  ;;  %v2377_v44 = vld [vmem:[#allocation41_spill] sm:$0xff] }
  0xec   :  { %v672_v2 = vadd.f32 %v671_v22, %v534_v51  ;;  %v606_v29 = vadd.f32 %v605_v9, %v475_v7  ;;  %v675_v27 = vadd.f32 %v536_v52, %v535_v0  ;;  %v351_v6 = vsub.f32 %v2370_v41, %v1701_v61  ;;  %v2374_v51 = vld [vmem:[#allocation61_spill] sm:$0xff]  ;;  %v2378_v22 = vld [vmem:[#allocation43_spill] sm:$0xff] }
  0xed   :  { %v352_v36 = vsub.f32 %v2371_v32, %v1701_v61  ;;  %v353_v53 = vsub.f32 %v2372_v47, %v1701_v61  ;;  %v354_v37 = vsub.f32 %v2373_v59, %v1701_v61  ;;  %v355_v7 = vsub.f32 %v2374_v51, %v1701_v61  ;;  %v2384_v59 = vld [vmem:[#allocation68_spill] sm:$0xff] }
  0xee   :  { %673 = vadd.xlane.f32.xlu1 %v672_v2  ;;  %v607_v57 = vadd.f32 %v606_v29, %v476_v3  ;;  %v676_v19 = vadd.f32 %v675_v27, %v537_v21  ;;  %v356_v40 = vsub.f32 %v2375_v35, %v1701_v61  ;;  %v542_v63 = vmul.f32 %v414_v46, %v414_v46  ;;  %v2380_v21 = vld [vmem:[#allocation48_spill] sm:$0xff]  ;;  %v2383_v29 = vld [vmem:[#allocation62_spill] sm:$0xff] }
  0xef   :  { %v357_v48 = vsub.f32 %v2376_v54, %v1701_v61  ;;  %v479_v18 = vmul.f32 %v351_v6, %v351_v6  ;;  %v480_v24 = vmul.f32 %v352_v36, %v352_v36  ;;  %v358_v16 = vsub.f32 %v1509_v42, %v1701_v61  ;;  %v2385_v54 = vld [vmem:[#allocation64_spill] sm:$0xff] }
  0xf0   :  { %v608_v11 = vadd.f32 %v607_v57, %v477_v31  ;;  %v677_v20 = vadd.f32 %v676_v19, %v538_v1  ;;  %v481_v8 = vmul.f32 %v353_v53, %v353_v53  ;;  %v482_v3 = vmul.f32 %v354_v37, %v354_v37  ;;  %v2379_v31 = vld [vmem:[#allocation44_spill] sm:$0xff] }
  0xf1   :  { %v483_v10 = vmul.f32 %v355_v7, %v355_v7  ;;  %v484_v12 = vmul.f32 %v356_v40, %v356_v40  ;;  %v485_v33 = vmul.f32 %v357_v48, %v357_v48  ;;  %v612_v17 = vadd.f32 %v480_v24, %v479_v18  ;;  %v2386_v18 = vld [vmem:[#allocation66_spill] sm:$0xff] }
  0xf2   :  { %v609_v34 = vadd.f32 %v608_v11, %v478_v43  ;;  %v678_v38 = vadd.f32 %v677_v20, %v539_v45  ;;  %v415_v0 = vsub.f32 %v2377_v44, %v1695_v49  ;;  %v416_v9 = vsub.f32 %v2378_v22, %v1695_v49  ;;  %v2382_v45 = vld [vmem:[#allocation60_spill] sm:$0xff] }
  0xf3   :  { %v417_v52 = vsub.f32 %v2379_v31, %v1695_v49  ;;  %v418_v42 = vsub.f32 %v2380_v21, %v1695_v49  ;;  %v419_v46 = vsub.f32 %v2381_v15, %v1695_v49  ;;  %v613_v43 = vadd.f32 %v612_v17, %v481_v8  ;;  %v2390_v17 = vld [vmem:[#allocation85_spill] sm:$0xff]  ;;  %v2391_v21 = vld [vmem:[#allocation88_spill] sm:$0xff] }
  0xf4   :  { %610 = vadd.xlane.f32.xlu0 %v609_v34  ;;  %v679_v1 = vadd.f32 %v678_v38, %v540_v50  ;;  %v420_v2 = vsub.f32 %v2382_v45, %v1695_v49  ;;  %v421_v27 = vsub.f32 %v2383_v29, %v1695_v49  ;;  %v486_v41 = vmul.f32 %v358_v16, %v358_v16  ;;  %v2388_v16 = vld [vmem:[#allocation71_spill] sm:$0xff] }
  0xf5   :  { %v543_v6 = vmul.f32 %v415_v0, %v415_v0  ;;  %v544_v32 = vmul.f32 %v416_v9, %v416_v9  ;;  %v545_v36 = vmul.f32 %v417_v52, %v417_v52  ;;  %v614_v53 = vadd.f32 %v613_v43, %v482_v3 }
  0xf6   :  { %v680_v47 = vadd.f32 %v679_v1, %v541_v55  ;;  %v422_v37 = vsub.f32 %v2384_v59, %v1695_v49  ;;  %v546_v57 = vmul.f32 %v418_v42, %v418_v42  ;;  %v547_v19 = vmul.f32 %v419_v46, %v419_v46  ;;  %v2387_v55 = vld [vmem:[#allocation67_spill] sm:$0xff] }
  0xf7   :  { %v548_v51 = vmul.f32 %v420_v2, %v420_v2  ;;  %v549_v50 = vmul.f32 %v421_v27, %v421_v27  ;;  %v684_v7 = vadd.f32 %v544_v32, %v543_v6  ;;  %v615_v40 = vadd.f32 %v614_v53, %v483_v10  ;;  %v2389_v10 = vld [vmem:[#allocation81_spill] sm:$0xff]  ;;  %v2392_v2 = vld [vmem:[#allocation56_spill] sm:$0xff]  ;;  %v2394_v32 = vld [vmem:[#allocation58_spill] sm:$0xff] }
  0xf8   :  { %v681_v35 = vadd.f32 %v680_v47, %v542_v63  ;;  %v359_v48 = vsub.f32 %v2385_v54, %v1721_v26  ;;  %v360_v24 = vsub.f32 %v2386_v18, %v1721_v26  ;;  %v361_v20 = vsub.f32 %v2387_v55, %v1721_v26  ;;  %v2393_v27 = vld [vmem:[#allocation57_spill] sm:$0xff]  ;;  %v2395_v53 = vld [vmem:[#allocation63_spill] sm:$0xff] }
  0xf9   :  { %v685_v11 = vadd.f32 %v684_v7, %v545_v36  ;;  %v362_v8 = vsub.f32 %v2388_v16, %v1721_v26  ;;  %v363_v3 = vsub.f32 %v1522_v58, %v1721_v26  ;;  %v616_v34 = vadd.f32 %v615_v40, %v484_v12 }
  0xfa   :  { %682 = vadd.xlane.f32.xlu1 %v681_v35  ;;  %v550_v63 = vmul.f32 %v422_v37, %v422_v37  ;;  %v364_v38 = vsub.f32 %v2389_v10, %v1721_v26  ;;  %v365_v44 = vsub.f32 %v2390_v17, %v1721_v26  ;;  %v487_v22 = vmul.f32 %v359_v48, %v359_v48  ;;  %v2396_v37 = vld [vmem:[#allocation70_spill] sm:$0xff]  ;;  %v2398_v35 = vld [vmem:[#allocation76_spill] sm:$0xff] }
  0xfb   :  { %v686_v0 = vadd.f32 %v685_v11, %v546_v57  ;;  %v488_v9 = vmul.f32 %v360_v24, %v360_v24  ;;  %v489_v31 = vmul.f32 %v361_v20, %v361_v20  ;;  %v617_v52 = vadd.f32 %v616_v34, %v485_v33  ;;  %v2399_v11 = vld [vmem:[#allocation83_spill] sm:$0xff]  ;;  %v2400_v17 = vld [vmem:[#allocation78_spill] sm:$0xff] }
  0xfc   :  { %v366_v42 = vsub.f32 %v2391_v21, %v1721_v26  ;;  %v490_v15 = vmul.f32 %v362_v8, %v362_v8  ;;  %v491_v46 = vmul.f32 %v363_v3, %v363_v3  ;;  %v492_v1 = vmul.f32 %v364_v38, %v364_v38 }
  0xfd   :  { %v687_v58 = vadd.f32 %v686_v0, %v547_v19  ;;  %v493_v12 = vmul.f32 %v365_v44, %v365_v44  ;;  %v621_v43 = vadd.f32 %v488_v9, %v487_v22  ;;  %v618_v45 = vadd.f32 %v617_v52, %v486_v41  ;;  %v2397_v41 = vld [vmem:[#allocation74_spill] sm:$0xff]  ;;  %v2401_v0 = vld [vmem:[#allocation79_spill] sm:$0xff] }
  0xfe   :  { %v423_v29 = vsub.f32 %v2392_v2, %v1719_v39  ;;  %v424_v6 = vsub.f32 %v2393_v27, %v1719_v39  ;;  %v425_v36 = vsub.f32 %v2394_v32, %v1719_v39  ;;  %v426_v59 = vsub.f32 %v2395_v53, %v1719_v39 }
  0xff   :  { %v688_v33 = vadd.f32 %v687_v58, %v548_v51  ;;  %v622_v47 = vadd.f32 %v621_v43, %v489_v31  ;;  %v427_v57 = vsub.f32 %v2396_v37, %v1719_v39  ;;  %619 = vadd.xlane.f32.xlu0 %v618_v45  ;;  %v494_v19 = vmul.f32 %v366_v42, %v366_v42  ;;  %v2403_v31 = vld [vmem:[#allocation84_spill] sm:$0xff] }
 0x100   :  { %v428_v7 = vsub.f32 %v2397_v41, %v1719_v39  ;;  %v429_v40 = vsub.f32 %v2398_v35, %v1719_v39  ;;  %v551_v54 = vmul.f32 %v423_v29, %v423_v29  ;;  %v552_v24 = vmul.f32 %v424_v6, %v424_v6  ;;  %v2406_v45 = vld [vmem:[#allocation92_spill] sm:$0xff] }
 0x101   :  { %v689_v48 = vadd.f32 %v688_v33, %v549_v50  ;;  %v623_v18 = vadd.f32 %v622_v47, %v490_v15  ;;  %v553_v51 = vmul.f32 %v425_v36, %v425_v36  ;;  %v430_v55 = vsub.f32 %v2399_v11, %v1719_v39  ;;  %v2402_v50 = vld [vmem:[#allocation80_spill] sm:$0xff]  ;;  %v2407_v36 = vld [vmem:[#allocation93_spill] sm:$0xff]  ;;  %v2412_v11 = vld [vmem:[#allocation82_spill] sm:$0xff] }
 0x102   :  { %v554_v20 = vmul.f32 %v426_v59, %v426_v59  ;;  %v555_v16 = vmul.f32 %v427_v57, %v427_v57  ;;  %v556_v8 = vmul.f32 %v428_v7, %v428_v7  ;;  %v557_v10 = vmul.f32 %v429_v40, %v429_v40  ;;  %v2408_v35 = vld [vmem:[#allocation72_spill] sm:$0xff] }
 0x103   :  { %v690_v3 = vadd.f32 %v689_v48, %v550_v63  ;;  %v624_v34 = vadd.f32 %v623_v18, %v491_v46  ;;  %v693_v38 = vadd.f32 %v552_v24, %v551_v54  ;;  %v367_v44 = vsub.f32 %v2400_v17, %v1739_v14  ;;  %v2404_v63 = vld [vmem:[#allocation87_spill] sm:$0xff]  ;;  %v2405_v46 = vld [vmem:[#allocation90_spill] sm:$0xff]  ;;  %v2411_v24 = vld [vmem:[#allocation77_spill] sm:$0xff] }
 0x104   :  { %v368_v22 = vsub.f32 %v2401_v0, %v1739_v14  ;;  %v369_v9 = vsub.f32 %v2402_v50, %v1739_v14  ;;  %v370_v52 = vsub.f32 %v2403_v31, %v1739_v14  ;;  %v371_v15 = vsub.f32 %v2404_v63, %v1739_v14  ;;  %v2410_v48 = vld [vmem:[#allocation75_spill] sm:$0xff] }
 0x105   :  { %691 = vadd.xlane.f32.xlu1 %v690_v3  ;;  %v625_v21 = vadd.f32 %v624_v34, %v492_v1  ;;  %v694_v42 = vadd.f32 %v693_v38, %v553_v51  ;;  %v372_v58 = vsub.f32 %v2405_v46, %v1739_v14  ;;  %v558_v43 = vmul.f32 %v430_v55, %v430_v55  ;;  %v2414_v34 = vld [vmem:[#allocation89_spill] sm:$0xff]  ;;  %v2415_v31 = vld [vmem:[#allocation91_spill] sm:$0xff] }
 0x106   :  { %v373_v2 = vsub.f32 %v2406_v45, %v1739_v14  ;;  %v495_v29 = vmul.f32 %v367_v44, %v367_v44  ;;  %v496_v27 = vmul.f32 %v368_v22, %v368_v22  ;;  %v374_v33 = vsub.f32 %v2407_v36, %v1739_v14  ;;  %v2416_v45 = vld [vmem:[#allocation95_spill] sm:$0xff]  ;;  %v2419_v36 = vld [vmem:[#allocation98_spill] sm:$0xff] }
 0x107   :  { %v626_v6 = vadd.f32 %v625_v21, %v493_v12  ;;  %v695_v32 = vadd.f32 %v694_v42, %v554_v20  ;;  %v497_v1 = vmul.f32 %v369_v9, %v369_v9  ;;  %v498_v47 = vmul.f32 %v370_v52, %v370_v52  ;;  %v2409_v12 = vld [vmem:[#allocation73_spill] sm:$0xff] }
 0x108   :  { %v499_v53 = vmul.f32 %v371_v15, %v371_v15  ;;  %v500_v59 = vmul.f32 %v372_v58, %v372_v58  ;;  %v501_v37 = vmul.f32 %v373_v2, %v373_v2  ;;  %v630_v7 = vadd.f32 %v496_v27, %v495_v29  ;;  %v2417_v29 = vld [vmem:[#allocation96_spill] sm:$0xff] }
 0x109   :  { %v627_v57 = vadd.f32 %v626_v6, %v494_v19  ;;  %v696_v41 = vadd.f32 %v695_v32, %v555_v16  ;;  %v431_v40 = vsub.f32 %v2408_v35, %v1737_v13  ;;  %v432_v54 = vsub.f32 %v2409_v12, %v1737_v13  ;;  %v2413_v16 = vld [vmem:[#allocation86_spill] sm:$0xff] }
 0x10a   :  { %v433_v18 = vsub.f32 %v2410_v48, %v1737_v13  ;;  %v434_v51 = vsub.f32 %v2411_v24, %v1737_v13  ;;  %v435_v55 = vsub.f32 %v2412_v11, %v1737_v13  ;;  %v631_v20 = vadd.f32 %v630_v7, %v497_v1  ;;  %v2420_v1 = vld [vmem:[#allocation99_spill] sm:$0xff] }
 0x10b   :  { %628 = vadd.xlane.f32.xlu0 %v627_v57  ;;  %v697_v19 = vadd.f32 %v696_v41, %v556_v8  ;;  %v436_v3 = vsub.f32 %v2413_v16, %v1737_v13  ;;  %v437_v38 = vsub.f32 %v2414_v34, %v1737_v13  ;;  %v502_v17 = vmul.f32 %v374_v33, %v374_v33  ;;  %v2422_v41 = vld [vmem:[#allocation101_spill] sm:$0xff] }
 0x10c   :  { %v559_v44 = vmul.f32 %v431_v40, %v431_v40  ;;  %v560_v0 = vmul.f32 %v432_v54, %v432_v54  ;;  %v561_v22 = vmul.f32 %v433_v18, %v433_v18  ;;  %v632_v9 = vadd.f32 %v631_v20, %v498_v47 }
 0x10d   :  { %v698_v50 = vadd.f32 %v697_v19, %v557_v10  ;;  %v438_v52 = vsub.f32 %v2415_v31, %v1737_v13  ;;  %v562_v21 = vmul.f32 %v434_v51, %v434_v51  ;;  %v563_v8 = vmul.f32 %v435_v55, %v435_v55  ;;  %v2418_v10 = vld [vmem:[#allocation97_spill] sm:$0xff] }
 0x10e   :  { %v564_v42 = vmul.f32 %v436_v3, %v436_v3  ;;  %v565_v63 = vmul.f32 %v437_v38, %v437_v38  ;;  %v702_v15 = vadd.f32 %v560_v0, %v559_v44  ;;  %v633_v58 = vadd.f32 %v632_v9, %v499_v53  ;;  %v2421_v53 = vld [vmem:[#allocation100_spill] sm:$0xff] }
 0x10f   :  { %v699_v46 = vadd.f32 %v698_v50, %v558_v43  ;;  %v876_v2 = vrot.slane %v1607_v23, %v2416_v45  ;;  %v881_v27 = vrot.slane %v1637_v62, %v2417_v29  ;;  %v888_v32 = vrot.slane %v1657_v60, %v2418_v10  ;;  %v2423_v60 = vld [vmem:[#allocation102_spill] sm:$0xff] }
 0x110   :  { %v703_v6 = vadd.f32 %v702_v15, %v561_v22  ;;  %v895_v33 = vrot.slane %v1669_v30, %v2419_v36  ;;  %v902_v47 = vrot.slane %v1681_v25, %v2420_v1  ;;  %v634_v57 = vadd.f32 %v633_v58, %v500_v59  ;;  %v2424_v30 = vld [vmem:[#allocation94_spill] sm:$0xff] }
 0x111   :  { %700 = vadd.xlane.f32.xlu1 %v699_v46  ;;  %v883_v43 = vsel %vm882_vm0, %v881_v27, %v876_v2  ;;  %v909_v23 = vrot.slane %v1701_v61, %v2421_v53  ;;  %v916_v62 = vrot.slane %v1721_v26, %v2422_v41  ;;  %v923_v40 = vrot.slane %v1739_v14, %v2423_v60 }
 0x112   :  { %v704_v7 = vadd.f32 %v703_v6, %v562_v21  ;;  %v890_v35 = vsel %vm889_vm1, %v888_v32, %v883_v43  ;;  %v929_v12 = vrot.slane %v2424_v30, %v2416_v45  ;;  %v635_v25 = vadd.f32 %v634_v57, %v501_v37 }
 0x113   :  { %v897_v59 = vsel %vm896_vm2, %v895_v33, %v890_v35  ;;  %v933_v54 = vrot.slane %v1633_v5, %v2417_v29  ;;  %v938_v61 = vrot.slane %v1649_v56, %v2418_v10  ;;  %v943_v18 = vrot.slane %v1659_v28, %v2419_v36 }
 0x114   :  { %v705_v48 = vadd.f32 %v704_v7, %v563_v8  ;;  %v904_v26 = vsel %vm903_vm3, %v902_v47, %v897_v59  ;;  %v948_v14 = vrot.slane %v1679_v4, %v2420_v1  ;;  %v636_v24 = vadd.f32 %v635_v25, %v502_v17 }
 0x115   :  { %v911_v37 = vsel %vm910_vm4, %v909_v23, %v904_v26  ;;  %v934_v51 = vsel %vm882_vm0, %v933_v54, %v929_v12  ;;  %v953_v5 = vrot.slane %v1695_v49, %v2421_v53  ;;  %v958_v19 = vrot.slane %v1719_v39, %v2422_v41 }
 0x116   :  { %v706_v11 = vadd.f32 %v705_v48, %v564_v42  ;;  %v918_v56 = vsel %vm917_vm5, %v916_v62, %v911_v37  ;;  %v939_v55 = vsel %vm889_vm1, %v938_v61, %v934_v51  ;;  %637 = vadd.xlane.f32.xlu0 %v636_v24  ;;  %v963_v20 = vrot.slane %v1737_v13, %v2423_v60 }
 0x117   :  { %v925_v28 = vsel %vm924_vm6, %v923_v40, %v918_v56  ;;  %v944_v4 = vsel %vm896_vm2, %v943_v18, %v939_v55  ;;  %v566_v16 = vmul.f32 %v438_v52, %v438_v52 }
 0x118   :  { %v707_v3 = vadd.f32 %v706_v11, %v565_v63  ;;  %v949_v49 = vsel %vm903_vm3, %v948_v14, %v944_v4  ;;  %968 = vst.msk [vmem:[#allocation5] sm:$0x1] %vm967_vm7, %v925_v28 }
 0x119   :  { %v954_v34 = vsel %vm910_vm4, %v953_v5, %v949_v49 }
 0x11a   :  { %v708_v38 = vadd.f32 %v707_v3, %v566_v16  ;;  %v959_v17 = vsel %vm917_vm5, %v958_v19, %v954_v34 }
 0x11b   :  { %v964_v39 = vsel %vm924_vm6, %v963_v20, %v959_v17 }
 0x11c   :  { %709 = vadd.xlane.f32.xlu1 %v708_v38  ;;  %969 = vst.msk [vmem:[#allocation5 + $0x2] sm:$0x1] %vm967_vm7, %v964_v39 }
 0x154   :  { %v575_v44 = vpop.xlane.xlu0 %574 }
 0x155   :  { %v711_v9 = vmul.f32 0.0009765625, %v575_v44 }
 0x157   :  { %v1935_v8 = vadd.f32 1e-08, %v711_v9 }
 0x158   :  { %v647_v22 = vpop.xlane.xlu0 %646 }
 0x159   :  { %v719_v15 = vmul.f32 0.0009765625, %v647_v22  ;;  %1091 = vrsqrt.f32 %v1935_v8  ;;  %vm745_vm8 = vcmp.eq.f32.partialorder %v1935_v8, inf  ;;  %vm747_vm9 = vcmp.eq.f32.partialorder %v1935_v8, 0.0 }
 0x15a   :  { %v748_v37 = vand.u32 2147483648, %v1935_v8 }
 0x15b   :  { %v1943_v2 = vadd.f32 1e-08, %v719_v15 }
 0x15c   :  { %v584_v0 = vpop.xlane.xlu1 %583 }
 0x15d   :  { %v712_v31 = vmul.f32 0.0009765625, %v584_v0  ;;  %vm801_vm10 = vcmp.eq.f32.partialorder %v1943_v2, inf  ;;  %vm803_vm11 = vcmp.eq.f32.partialorder %v1943_v2, 0.0  ;;  %v804_v56 = vand.u32 2147483648, %v1943_v2 }
 0x15f   :  { %v1937_v63 = vadd.f32 1e-08, %v712_v31 }
 0x161   :  { %1093 = vrsqrt.f32 %v1937_v63  ;;  %vm752_vm12 = vcmp.eq.f32.partialorder %v1937_v63, inf  ;;  %v755_v49 = vand.u32 2147483648, %v1937_v63  ;;  %vm754_vm14 = vcmp.eq.f32.partialorder %v1937_v63, 0.0 }
 0x163   :  { %v656_v13 = vpop.xlane.xlu1 %655  ;;  %v1092_v35 = vpop.eup %1091 }
 0x164   :  { %v720_v46 = vmul.f32 0.0009765625, %v656_v13  ;;  %v744_v59 = vmul.f32 %v1092_v35, %v1935_v8 }
 0x166   :  { %v1945_v6 = vadd.f32 1e-08, %v720_v46  ;;  %v746_v28 = vsel %vm745_vm8, %v1935_v8, %v744_v59 }
 0x167   :  { %v749_v22 = vsel %vm747_vm9, %v748_v37, %v746_v28 }
 0x168   :  { %vm808_vm15 = vcmp.eq.f32.partialorder %v1945_v6, inf  ;;  %v811_v15 = vand.u32 2147483648, %v1945_v6  ;;  %vm810_vm9 = vcmp.eq.f32.partialorder %v1945_v6, 0.0 }
 0x169   :  { %v593_v50 = vpop.xlane.xlu0 %592 }
 0x16a   :  { %v713_v52 = vmul.f32 0.0009765625, %v593_v50 }
 0x16b   :  { %v1094_v30 = vpop.eup %1093 }
 0x16c   :  { %v1939_v58 = vadd.f32 1e-08, %v713_v52  ;;  %v751_v48 = vmul.f32 %v1094_v30, %v1937_v63 }
 0x16e   :  { %1095 = vrsqrt.f32 %v1939_v58  ;;  %v753_v20 = vsel %vm752_vm12, %v1937_v63, %v751_v48  ;;  %vm759_vm13 = vcmp.eq.f32.partialorder %v1939_v58, inf  ;;  %v762_v50 = vand.u32 2147483648, %v1939_v58 }
 0x16f   :  { %v665_v21 = vpop.xlane.xlu1 %664  ;;  %1097 = vrsqrt.f32 %v1943_v2  ;;  %v756_v13 = vsel %vm754_vm14, %v755_v49, %v753_v20  ;;  %vm761_vm8 = vcmp.eq.f32.partialorder %v1939_v58, 0.0 }
 0x170   :  { %v721_v32 = vmul.f32 0.0009765625, %v665_v21  ;;  %1099 = vrsqrt.f32 %v1945_v6  ;;  %v993_v63 = vrot.slane %v756_v13, %v2417_v29 }
 0x172   :  { %v1950_v57 = vadd.f32 1e-08, %v721_v32 }
 0x174   :  { %1101 = vrsqrt.f32 %v1950_v57 }
 0x175   :  { %v602_v42 = vpop.xlane.xlu0 %601 }
 0x176   :  { %v714_v47 = vmul.f32 0.0009765625, %v602_v42 }
 0x178   :  { %v1952_v43 = vadd.f32 1e-08, %v714_v47  ;;  %v1096_v25 = vpop.eup %1095 }
 0x179   :  { %v1098_v24 = vpop.eup %1097  ;;  %v758_v55 = vmul.f32 %v1096_v25, %v1939_v58 }
 0x17a   :  { %1103 = vrsqrt.f32 %v1952_v43  ;;  %v1100_v11 = vpop.eup %1099  ;;  %v800_v16 = vmul.f32 %v1098_v24, %v1943_v2  ;;  %vm766_vm12 = vcmp.eq.f32.partialorder %v1952_v43, inf  ;;  %v769_v59 = vand.u32 2147483648, %v1952_v43 }
 0x17b   :  { %v674_v27 = vpop.xlane.xlu1 %673  ;;  %v807_v34 = vmul.f32 %v1100_v11, %v1945_v6  ;;  %v760_v17 = vsel %vm759_vm13, %v1939_v58, %v758_v55  ;;  %vm768_vm13 = vcmp.eq.f32.partialorder %v1952_v43, 0.0 }
 0x17c   :  { %v722_v40 = vmul.f32 0.0009765625, %v674_v27  ;;  %v802_v31 = vsel %vm801_vm10, %v1943_v2, %v800_v16  ;;  %v763_v21 = vsel %vm761_vm8, %v762_v50, %v760_v17  ;;  %v989_v27 = vrot.slane %v749_v22, %v2416_v45 }
 0x17d   :  { %v809_v52 = vsel %vm808_vm15, %v1945_v6, %v807_v34  ;;  %v2011_v58 = vsel %vm803_vm11, %v804_v56, %v802_v31  ;;  %vm815_vm10 = vcmp.eq.f32.partialorder %v1950_v57, inf  ;;  %vm817_vm11 = vcmp.eq.f32.partialorder %v1950_v57, 0.0 }
 0x17e   :  { %v1962_v26 = vadd.f32 1e-08, %v722_v40  ;;  %v1102_v38 = vpop.eup %1101  ;;  %v2016_v32 = vsel %vm810_vm9, %v811_v15, %v809_v52  ;;  %v994_v6 = vsel %vm882_vm0, %v993_v63, %v989_v27  ;;  %v1028_v35 = vrot.slane %v2011_v58, %v2416_v45 }
 0x17f   :  { %v814_v8 = vmul.f32 %v1102_v38, %v1950_v57  ;;  %v818_v40 = vand.u32 2147483648, %v1950_v57  ;;  %v1032_v25 = vrot.slane %v2016_v32, %v2417_v29 }
 0x180   :  { %vm822_vm14 = vcmp.eq.f32.partialorder %v1962_v26, inf  ;;  %vm824_vm15 = vcmp.eq.f32.partialorder %v1962_v26, 0.0  ;;  %v825_v56 = vand.u32 2147483648, %v1962_v26 }
 0x181   :  { %v611_v33 = vpop.xlane.xlu0 %610 }
 0x182   :  { %v715_v7 = vmul.f32 0.0009765625, %v611_v33  ;;  %v998_v33 = vrot.slane %v763_v21, %v2418_v10 }
 0x184   :  { %v1958_v54 = vadd.f32 1e-08, %v715_v7  ;;  %v1104_v0 = vpop.eup %1103 }
 0x185   :  { %v765_v46 = vmul.f32 %v1104_v0, %v1952_v43 }
 0x186   :  { %1105 = vrsqrt.f32 %v1958_v54  ;;  %vm773_vm8 = vcmp.eq.f32.partialorder %v1958_v54, inf  ;;  %vm775_vm9 = vcmp.eq.f32.partialorder %v1958_v54, 0.0  ;;  %v776_v34 = vand.u32 2147483648, %v1958_v54 }
 0x187   :  { %v683_v23 = vpop.xlane.xlu1 %682  ;;  %1107 = vrsqrt.f32 %v1962_v26  ;;  %v767_v30 = vsel %vm766_vm12, %v1952_v43, %v765_v46 }
 0x188   :  { %v723_v18 = vmul.f32 0.0009765625, %v683_v23  ;;  %v770_v37 = vsel %vm768_vm13, %v769_v59, %v767_v30 }
 0x189   :  { %v1003_v16 = vrot.slane %v770_v37, %v2419_v36 }
 0x18a   :  { %v1981_v3 = vadd.f32 1e-08, %v723_v18  ;;  %v999_v18 = vsel %vm889_vm1, %v998_v33, %v994_v6 }
 0x18c   :  { %v620_v62 = vpop.xlane.xlu0 %619  ;;  %vm831_vm12 = vcmp.eq.f32.partialorder %v1981_v3, 0.0  ;;  %v832_v31 = vand.u32 2147483648, %v1981_v3 }
 0x18d   :  { %v716_v12 = vmul.f32 0.0009765625, %v620_v62  ;;  %v816_v62 = vsel %vm815_vm10, %v1950_v57, %v814_v8  ;;  %vm829_vm10 = vcmp.eq.f32.partialorder %v1981_v3, inf }
 0x18f   :  { %v1966_v51 = vadd.f32 1e-08, %v716_v12 }
 0x190   :  { %v1106_v23 = vpop.eup %1105 }
 0x191   :  { %1109 = vrsqrt.f32 %v1966_v51  ;;  %v1108_v7 = vpop.eup %1107  ;;  %v772_v24 = vmul.f32 %v1106_v23, %v1958_v54  ;;  %v783_v13 = vand.u32 2147483648, %v1966_v51 }
 0x192   :  { %v692_v61 = vpop.xlane.xlu1 %691  ;;  %v821_v11 = vmul.f32 %v1108_v7, %v1962_v26 }
 0x193   :  { %v724_v19 = vmul.f32 0.0009765625, %v692_v61  ;;  %v774_v49 = vsel %vm773_vm8, %v1958_v54, %v772_v24  ;;  %vm782_vm8 = vcmp.eq.f32.partialorder %v1966_v51, 0.0  ;;  %v1004_v54 = vsel %vm896_vm2, %v1003_v16, %v999_v18 }
 0x194   :  { %v777_v22 = vsel %vm775_vm9, %v776_v34, %v774_v49  ;;  %v1033_v18 = vsel %vm882_vm0, %v1032_v25, %v1028_v35 }
 0x195   :  { %v1989_v39 = vadd.f32 1e-08, %v724_v19  ;;  %v1008_v46 = vrot.slane %v777_v22, %v2420_v1 }
 0x197   :  { %vm836_vm9 = vcmp.eq.f32.partialorder %v1989_v39, inf  ;;  %v1009_v59 = vsel %vm903_vm3, %v1008_v46, %v1004_v54 }
 0x198   :  { %v629_v14 = vpop.xlane.xlu0 %628 }
 0x199   :  { %v717_v5 = vmul.f32 0.0009765625, %v629_v14  ;;  %v2034_v14 = vsel %vm817_vm11, %v818_v40, %v816_v62  ;;  %vm780_vm11 = vcmp.eq.f32.partialorder %v1966_v51, inf }
 0x19a   :  { %v1037_v43 = vrot.slane %v2034_v14, %v2418_v10  ;;  %v823_v10 = vsel %vm822_vm14, %v1962_v26, %v821_v11 }
 0x19b   :  { %v1976_v4 = vadd.f32 1e-08, %v717_v5  ;;  %v1110_v12 = vpop.eup %1109  ;;  %v826_v15 = vsel %vm824_vm15, %v825_v56, %v823_v10 }
 0x19c   :  { %v779_v55 = vmul.f32 %v1110_v12, %v1966_v51  ;;  %v1042_v40 = vrot.slane %v826_v15, %v2419_v36  ;;  %v1038_v36 = vsel %vm889_vm1, %v1037_v43, %v1033_v18 }
 0x19d   :  { %1111 = vrsqrt.f32 %v1976_v4  ;;  %vm787_vm13 = vcmp.eq.f32.partialorder %v1976_v4, inf  ;;  %v790_v52 = vand.u32 2147483648, %v1976_v4  ;;  %vm789_vm14 = vcmp.eq.f32.partialorder %v1976_v4, 0.0 }
 0x19e   :  { %v701_v44 = vpop.xlane.xlu1 %700  ;;  %1113 = vrsqrt.f32 %v1981_v3  ;;  %v781_v0 = vsel %vm780_vm11, %v1966_v51, %v779_v55  ;;  %vm838_vm11 = vcmp.eq.f32.partialorder %v1989_v39, 0.0  ;;  %v1043_v32 = vsel %vm896_vm2, %v1042_v40, %v1038_v36 }
 0x19f   :  { %v725_v9 = vmul.f32 0.0009765625, %v701_v44  ;;  %1115 = vrsqrt.f32 %v1989_v39  ;;  %v784_v63 = vsel %vm782_vm8, %v783_v13, %v781_v0 }
 0x1a0   :  { %v1013_v26 = vrot.slane %v784_v63, %v2421_v53 }
 0x1a1   :  { %v2003_v42 = vadd.f32 1e-08, %v725_v9 }
 0x1a3   :  { %1117 = vrsqrt.f32 %v2003_v42  ;;  %v638_v47 = vpop.xlane.xlu0 %637  ;;  %v846_v7 = vand.u32 2147483648, %v2003_v42 }
 0x1a4   :  { %v718_v2 = vmul.f32 0.0009765625, %v638_v47  ;;  %v839_v47 = vand.u32 2147483648, %v1989_v39 }
 0x1a6   :  { %v2031_v61 = vadd.f32 1e-08, %v718_v2 }
 0x1a7   :  { %v1112_v48 = vpop.eup %1111 }
 0x1a8   :  { %1119 = vrsqrt.f32 %v2031_v61  ;;  %v1114_v5 = vpop.eup %1113  ;;  %v786_v28 = vmul.f32 %v1112_v48, %v1976_v4  ;;  %vm794_vm15 = vcmp.eq.f32.partialorder %v2031_v61, inf  ;;  %v797_v6 = vand.u32 2147483648, %v2031_v61 }
 0x1a9   :  { %v710_v57 = vpop.xlane.xlu1 %709  ;;  %v1116_v20 = vpop.eup %1115  ;;  %v828_v44 = vmul.f32 %v1114_v5, %v1981_v3 }
 0x1aa   :  { %v726_v19 = vmul.f32 0.0009765625, %v710_v57  ;;  %v835_v50 = vmul.f32 %v1116_v20, %v1989_v39  ;;  %v788_v9 = vsel %vm787_vm13, %v1976_v4, %v786_v28  ;;  %vm845_vm13 = vcmp.eq.f32.partialorder %v2003_v42, 0.0 }
 0x1ab   :  { %v830_v8 = vsel %vm829_vm10, %v1981_v3, %v828_v44  ;;  %v791_v27 = vsel %vm789_vm14, %v790_v52, %v788_v9  ;;  %vm843_vm10 = vcmp.eq.f32.partialorder %v2003_v42, inf }
 0x1ac   :  { %v2052_v38 = vadd.f32 1e-08, %v726_v19  ;;  %v837_v33 = vsel %vm836_vm9, %v1989_v39, %v835_v50  ;;  %v833_v4 = vsel %vm831_vm12, %v832_v31, %v830_v8  ;;  %v1018_v2 = vrot.slane %v791_v27, %v2422_v41 }
 0x1ad   :  { %v1118_v17 = vpop.eup %1117  ;;  %v840_v39 = vsel %vm838_vm11, %v839_v47, %v837_v33  ;;  %vm796_vm12 = vcmp.eq.f32.partialorder %v2031_v61, 0.0 }
 0x1ae   :  { %1121 = vrsqrt.f32 %v2052_v38  ;;  %v842_v21 = vmul.f32 %v1118_v17, %v2003_v42  ;;  %v1052_v24 = vrot.slane %v840_v39, %v2421_v53  ;;  %vm850_vm8 = vcmp.eq.f32.partialorder %v2052_v38, inf }
 0x1af   :  { %v853_v29 = vand.u32 2147483648, %v2052_v38  ;;  %vm852_vm0 = vcmp.eq.f32.partialorder %v2052_v38, 0.0 }
 0x1b0   :  { %v844_v23 = vsel %vm843_vm10, %v2003_v42, %v842_v21  ;;  %v1047_v42 = vrot.slane %v833_v4, %v2420_v1 }
 0x1b1   :  { %v847_v30 = vsel %vm845_vm13, %v846_v7, %v844_v23 }
 0x1b2   :  { %v1120_v51 = vpop.eup %1119  ;;  %v1057_v45 = vrot.slane %v847_v30, %v2422_v41  ;;  %v1048_v35 = vsel %vm903_vm3, %v1047_v42, %v1043_v32 }
 0x1b3   :  { %v793_v62 = vmul.f32 %v1120_v51, %v2031_v61  ;;  %v1053_v25 = vsel %vm910_vm4, %v1052_v24, %v1048_v35 }
 0x1b4   :  { %v1058_v5 = vsel %vm917_vm5, %v1057_v45, %v1053_v25 }
 0x1b5   :  { %v795_v3 = vsel %vm794_vm15, %v2031_v61, %v793_v62  ;;  %v1014_v61 = vsel %vm910_vm4, %v1013_v26, %v1009_v59 }
 0x1b6   :  { %v798_v12 = vsel %vm796_vm12, %v797_v6, %v795_v3  ;;  %v1019_v57 = vsel %vm917_vm5, %v1018_v2, %v1014_v61 }
 0x1b7   :  { %v1023_v14 = vrot.slane %v798_v12, %v2423_v60 }
 0x1b8   :  { %v1122_v48 = vpop.eup %1121 }
 0x1b9   :  { %v849_v37 = vmul.f32 %v1122_v48, %v2052_v38  ;;  %v1024_v1 = vsel %vm924_vm6, %v1023_v14, %v1019_v57 }
 0x1ba   :  { %1066 = vst.msk [vmem:[#allocation5 + $0x1] sm:$0x1] %vm967_vm7, %v1024_v1 }
 0x1bb   :  { %v851_v58 = vsel %vm850_vm8, %v2052_v38, %v849_v37 }
 0x1bc   :  { %v854_v53 = vsel %vm852_vm0, %v853_v29, %v851_v58 }
 0x1bd   :  { %v1062_v41 = vrot.slane %v854_v53, %v2423_v60 }
 0x1bf   :  { %v1063_v11 = vsel %vm924_vm6, %v1062_v41, %v1058_v5 }
 0x1c0   :  { %1067 = vst.msk [vmem:[#allocation5 + $0x3] sm:$0x1] %vm967_vm7, %v1063_v11 }
 0x1c1   :  { %1156 = shalt.err (!%p1153_p12)
}
 0x1c2   :  { %s1157_s24 = scalar_lea.hbm %s2139_s1, 64 }
 0x1c3   :  { %p1158_p13 = scmp.ne.s32.totalorder %s2139_s1, %s1157_s24  ;;  %p1161_p0 = scmp.lt.u32.totalorder %s1157_s24, %s2139_s1 }
 0x1c5   :  { %p1163_p1 = pnand %p1161_p0, %p1158_p13 }
 0x1c7   :  { %1166 = shalt.err (!%p1163_p1)
}
 0x1c8   :  { %s1175_s29 = smov 32   ;;  %s1176_s30 = smov 2  }
 0x1c9   :  { %1079 = dma.vmem_to_hbm [thread:$0]  %s1074_s20, 64, %s2139_s1, [#allocation4], %s1175_s29, %s1175_s29, %s1176_s30  }
 0x1ca   :  { %1169 = dma.done.wait [#allocation4], 64  }
 0x1cb   :  { %1170 = vsyncadd [#allocation4], 4294967232 }
 0x1cc   :  { %1083 = vsyncpa [#allocation3], 1 }
 0x1cd   :  { %1084 = vsyncpa [#allocation4], 1 }

</bundles_post_ra>
